<compile_context>
chip_gen: v6e
topology: v6e:2x2x1
jax: 0.10.0
libtpu: 0.0.40
codegen_flags: <defaults>
</compile_context>

<pallas_src>
import functools

import jax
import jax.numpy as jnp
from jax import lax
from jax.experimental import pallas as pl
from jax.experimental.pallas import tpu as pltpu


def _round_up(x, m):
    return ((x + m - 1) // m) * m


def _vmem_capacity_bytes():
    """Per-core VMEM capacity; conservative fallback (v7x per-TC) if unknown."""
    try:
        info_fn = getattr(pltpu, "get_tpu_info", None)
        if info_fn is not None:
            cap = int(info_fn().vmem_capacity_bytes)
            if cap > 0:
                return cap
    except Exception:
        pass
    return 64 * 1024 * 1024


def _derive_time_block(T, NP, F, HP, cdt_size, out_size, budget_bytes):
    """Largest divisor of T whose double-buffered blocks fit the VMEM budget."""
    # Weights double-buffered in compute dtype; fused bias stays f32; h scratch f32.
    fixed = 2 * cdt_size * (F * 3 * HP + HP * 2 * HP + HP * HP)
    fixed += 2 * 4 * (3 * HP)              # b3 (f32), double-buffered
    fixed += NP * HP * 4                   # carried hidden state scratch (f32)
    per_t = 2 * NP * (NP * cdt_size + F * cdt_size + HP * out_size)
    avail = max(budget_bytes - fixed, per_t)
    tb_cap = max(1, int(avail // per_t))
    best = 1
    for d in range(1, T + 1):
        if T % d == 0 and d <= tb_cap:
            best = d
    return best


# --------------------- fused serial GRU recurrence kernel -------------------

def _gru_kernel(a_ref, x_ref, wx3_ref, b3_ref, wh2_ref, whh_ref,
                out_ref, h_scratch, *, hp, unroll):
    """Tb recurrent GraphGRU steps; hidden state carried across grid in VMEM.

    Per step (associativity-reordered GCNs, biases pre-summed into b3):
        px    = (Â @ X) @ [Wxz|Wxr|Wxh] + [bxz+bhz | bxr+bhr | bxh+bhh]
        zr    = (Â @ h) @ [Whz|Whr]
        z, r  = sigmoid(px[:, :H] + zr[:, :H]), sigmoid(px[:, H:2H] + zr[:, H:2H])
        h_hat = tanh(px[:, 2H:] + (Â @ (r*h)) @ Whh)
        h     = z * h[0]  + (1 - z) * h_hat          # module's row-0 broadcast
    """
    @pl.when(pl.program_id(0) == 0)
    def _():
        # h defaults to zeros when not supplied (h=None in forward()).
        h_scratch[...] = jnp.zeros_like(h_scratch)

    cdt = a_ref.dtype                     # MXU operand dtype (bf16 or f32)
    wx3 = wx3_ref[...]                    # (F, 3HP)   fused [Wxz|Wxr|Wxh]
    b3 = b3_ref[...]                      # (1, 3HP)   fused, pre-summed biases (f32)
    wh2 = wh2_ref[...]                    # (HP, 2HP)  fused [Whz|Whr]
    whh = whh_ref[...]                    # (HP, HP)
    tb = a_ref.shape[0]

    def step(t, h):
        a = a_ref[t]                      # (NP, NP)
        x = x_ref[t]                      # (NP, F)

        # x path: (Â @ X) @ Wx3 + b3   -- aggregation only F lanes wide.
        ax = jnp.dot(a, x, preferred_element_type=jnp.float32)
        px = jnp.dot(ax.astype(cdt), wx3,
                     preferred_element_type=jnp.float32) + b3

        # z / r gates: (Â @ h) @ [Whz|Whr]  -- aggregation HP lanes wide.
        ah = jnp.dot(a, h.astype(cdt), preferred_element_type=jnp.float32)
        zr = jnp.dot(ah.astype(cdt), wh2, preferred_element_type=jnp.float32)
        z = jax.nn.sigmoid(px[:, :hp] + zr[:, :hp])
        r = jax.nn.sigmoid(px[:, hp:2 * hp] + zr[:, hp:2 * hp])

        # candidate state: (Â @ (r*h)) @ Whh.
        arh = jnp.dot(a, (r * h).astype(cdt),
                      preferred_element_type=jnp.float32)
        hh = jnp.dot(arh.astype(cdt), whh, preferred_element_type=jnp.float32)
        h_hat = jnp.tanh(px[:, 2 * hp:] + hh)

        # Reproduce `z_g * h[i]` with i == 0: broadcast row 0 of previous h.
        h_new = z * h[0:1, :] + (1.0 - z) * h_hat

        out_ref[t] = h_new.astype(out_ref.dtype)
        return h_new

    # Functional carry inside the block; single scratch store per block.
    h_final = lax.fori_loop(0, tb, step, h_scratch[...], unroll=unroll)
    h_scratch[...] = h_final


# --------------------------------- wrapper ----------------------------------

def graph_gru_forward(adj_norm, xs, params, *, compute_dtype=jnp.bfloat16,
                      time_block=None, vmem_budget_frac=0.75):
    """adj_norm: (T, N, N) f32, xs: (T, N, F) f32 -> (T, N, H) f32."""
    T, N, F = xs.shape
    H = params["wxz"].shape[1]

    HP = _round_up(H, 128)                # lane-dense hidden width
    NP = _round_up(N, 8)                  # sublane-aligned node count

    cdt = jnp.dtype(compute_dtype)
    cdt_size = cdt.itemsize
    # Halve the writeback stream when running bf16 operands (review: v5e win).
    out_dtype = jnp.float32 if cdt == jnp.dtype(jnp.float32) else jnp.bfloat16
    out_size = jnp.dtype(out_dtype).itemsize

    def pad2(w, r, c):
        return jnp.zeros((r, c), jnp.float32).at[:w.shape[0], :w.shape[1]].set(w)

    # Fused x-path weight (F, 3HP) = [Wxz | Wxr | Wxh] (each padded to HP).
    wx3 = jnp.concatenate([pad2(params["wxz"], F, HP),
                           pad2(params["wxr"], F, HP),
                           pad2(params["wxh"], F, HP)], axis=1)
    # Fused, pre-summed biases (1, 3HP) = [bxz+bhz | bxr+bhr | bxh+bhh] (f32).
    b3 = jnp.concatenate([pad2(params["bxz"] + params["bhz"], 1, HP),
                          pad2(params["bxr"] + params["bhr"], 1, HP),
                          pad2(params["bxh"] + params["bhh"], 1, HP)], axis=1)
    # Fused h-path weight for z|r (HP, 2HP); Whh stays separate (needs r*h).
    wh2 = jnp.concatenate([pad2(params["whz"], HP, HP),
                           pad2(params["whr"], HP, HP)], axis=1)
    whh = pad2(params["whh"], HP, HP)

    # Pad nodes to a sublane multiple (zero rows/cols never touch real rows).
    a_p = jnp.zeros((T, NP, NP), jnp.float32).at[:, :N, :N].set(adj_norm)
    x_p = jnp.zeros((T, NP, F), jnp.float32).at[:, :N, :].set(xs)

    a_c, x_c = a_p.astype(cdt), x_p.astype(cdt)
    wx3_c, wh2_c, whh_c = wx3.astype(cdt), wh2.astype(cdt), whh.astype(cdt)

    # Generation-aware VMEM budget (v5e/v6e 128 MiB, v7x 64 MiB per TC).
    vmem_budget = int(_vmem_capacity_bytes() * vmem_budget_frac)

    if time_block is None:
        Tb = _derive_time_block(T, NP, F, HP, cdt_size, out_size, vmem_budget)
    else:
        Tb = time_block
    assert T % Tb == 0, "time_block must divide T"
    unroll = int(min(Tb, 8))              # capped unroll (avoid vreg pressure)

    h_out = pl.pallas_call(
        functools.partial(_gru_kernel, hp=HP, unroll=unroll),
        out_shape=jax.ShapeDtypeStruct((T, NP, HP), out_dtype),
        grid_spec=pltpu.PrefetchScalarGridSpec(
            num_scalar_prefetch=0,
            grid=(T // Tb,),
            in_specs=[
                pl.BlockSpec((Tb, NP, NP), lambda b: (b, 0, 0)),     # Â(t)
                pl.BlockSpec((Tb, NP, F), lambda b: (b, 0, 0)),      # X(t)
                pl.BlockSpec((F, 3 * HP), lambda b: (0, 0)),         # [Wxz|Wxr|Wxh]
                pl.BlockSpec((1, 3 * HP), lambda b: (0, 0)),         # fused biases
                pl.BlockSpec((HP, 2 * HP), lambda b: (0, 0)),        # [Whz|Whr]
                pl.BlockSpec((HP, HP), lambda b: (0, 0)),            # Whh
            ],
            out_specs=pl.BlockSpec((Tb, NP, HP), lambda b: (b, 0, 0)),
            scratch_shapes=[pltpu.VMEM((NP, HP), jnp.float32)],      # carried h
        ),
        compiler_params=pltpu.CompilerParams(
            dimension_semantics=("arbitrary",),   # h carried across time
            vmem_limit_bytes=vmem_budget),
    )(a_c, x_c, wx3_c, b3, wh2_c, whh_c)

    return h_out[:, :N, :H].astype(jnp.float32)


# ----------------------------- glue / reference -----------------------------

def dense_gcn_norm(edge_index, num_nodes):
    """edge_index: (2, E) int32 [src; dst] -> normalized dense adjacency.

    NOTE: duplicate edges collapse to weight 1 and self-loops are always added
    (edge lists already containing self-loops get weight 2) -- glue only.
    """
    src, dst = edge_index[0], edge_index[1]
    a = jnp.zeros((num_nodes, num_nodes), jnp.float32).at[dst, src].set(1.0)
    a = a + jnp.eye(num_nodes, dtype=jnp.float32)          # add_self_loops
    deg = a.sum(axis=1)
    dinv = jnp.where(deg > 0, jax.lax.rsqrt(deg), 0.0)
    return dinv[:, None] * a * dinv[None, :]


def reference_forward(adj_norm, xs, p):
    """Pure-JAX reference of GraphGRU.forward (n_layers=1, eval mode)."""
    T, N, F = xs.shape
    H = p["wxz"].shape[1]
    gcn = lambda a, f, w, b: a @ (f @ w) + b
    h = jnp.zeros((N, H), jnp.float32)
    outs = []
    for t in range(T):
        a, x = adj_norm[t], xs[t]
        z = jax.nn.sigmoid(gcn(a, x, p["wxz"], p["bxz"]) + gcn(a, h, p["whz"], p["bhz"]))
        r = jax.nn.sigmoid(gcn(a, x, p["wxr"], p["bxr"]) + gcn(a, h, p["whr"], p["bhr"]))
        hh = jnp.tanh(gcn(a, x, p["wxh"], p["bxh"]) + gcn(a, r * h, p["whh"], p["bhh"]))
        h = z * h[0] + (1.0 - z) * hh    # original module's h[i] (i==0) broadcast
        outs.append(h)
    return jnp.stack(outs)


if __name__ == "__main__":
    # Small shapes consistent with the module's forward:
    #   xs: (T, N, in_size) node features over time, hidden_size = H.
    T, N, IN_SIZE, HIDDEN = 4, 16, 8, 32
    NUM_EDGES = 48

    key = jax.random.PRNGKey(0)
    k_x, k_e, k_w = jax.random.split(key, 3)

    xs = jax.random.normal(k_x, (T, N, IN_SIZE), jnp.float32)

    # Deterministic per-timestep edge lists (the role of `eis` / mask_fn).
    edge_keys = jax.random.split(k_e, T)
    adj_norm = jnp.stack([
        dense_gcn_norm(
            jax.random.randint(edge_keys[t], (2, NUM_EDGES), 0, N, jnp.int32), N)
        for t in range(T)
    ])

    # Deterministic parameter init (glorot-ish weights, zero biases as in GCNConv).
    def glorot(k, shape):
        fan_in, fan_out = shape
        s = jnp.sqrt(6.0 / (fan_in + fan_out))
        return jax.random.uniform(k, shape, jnp.float32, -s, s)

    wk = jax.random.split(k_w, 6)
    params = {
        "wxz": glorot(wk[0], (IN_SIZE, HIDDEN)),
        "whz": glorot(wk[1], (HIDDEN, HIDDEN)),
        "wxr": glorot(wk[2], (IN_SIZE, HIDDEN)),
        "whr": glorot(wk[3], (HIDDEN, HIDDEN)),
        "wxh": glorot(wk[4], (IN_SIZE, HIDDEN)),
        "whh": glorot(wk[5], (HIDDEN, HIDDEN)),
        "bxz": jnp.zeros((1, HIDDEN), jnp.float32),
        "bhz": jnp.zeros((1, HIDDEN), jnp.float32),
        "bxr": jnp.zeros((1, HIDDEN), jnp.float32),
        "bhr": jnp.zeros((1, HIDDEN), jnp.float32),
        "bxh": jnp.zeros((1, HIDDEN), jnp.float32),
        "bhh": jnp.zeros((1, HIDDEN), jnp.float32),
    }

    ref = reference_forward(adj_norm, xs, params)

    # f32 MXU operands: parity with the f32 reference (rounding order differs
    # slightly because of the (Â@X)@W association, hence 1e-4 tolerance).
    out_f32 = graph_gru_forward(adj_norm, xs, params,
                                compute_dtype=jnp.float32)
    out_f32 = jax.block_until_ready(out_f32)
    assert out_f32.shape == (T, N, HIDDEN)
    assert jnp.allclose(out_f32, ref, atol=1e-4, rtol=1e-4), "f32 mismatch vs reference"

    # Default bf16 MXU operands (f32 accumulation / gating), 2 timesteps per
    # grid block to exercise the cross-block hidden-state carry.
    out_bf16 = graph_gru_forward(adj_norm, xs, params, time_block=2)
    out_bf16 = jax.block_until_ready(out_bf16)
    assert out_bf16.shape == (T, N, HIDDEN)
    assert jnp.allclose(out_bf16, ref, atol=1e-1, rtol=1e-1), "bf16 mismatch vs reference"

    print("KERNEL_OK")
</pallas_src>

<mosaic_0001>
module attributes {stable_mosaic.version = 11 : i64} {
  func.func @_gru_kernel(%arg0: i32, %arg1: memref<4x16x16xf32, #tpu.memory_space<vmem>>, %arg2: memref<4x16x8xf32, #tpu.memory_space<vmem>>, %arg3: memref<8x384xf32, #tpu.memory_space<vmem>>, %arg4: memref<1x384xf32, #tpu.memory_space<vmem>>, %arg5: memref<128x256xf32, #tpu.memory_space<vmem>>, %arg6: memref<128x128xf32, #tpu.memory_space<vmem>>, %arg7: memref<4x16x128xf32, #tpu.memory_space<vmem>>, %arg8: memref<16x128xf32, #tpu.memory_space<vmem>>) attributes {dimension_semantics = [#tpu.dimension_semantics<arbitrary>], iteration_bounds = array<i64: 1>, scalar_prefetch = 0 : i64, scratch_operands = 1 : i64, tpu.core_type = #tpu.core_type<tc>, window_params = [{transform_indices = @transform_0, window_bounds = array<i64: 4, 16, 16>}, {transform_indices = @transform_1, window_bounds = array<i64: 4, 16, 8>}, {pipeline_mode = #tpu.pipeline_mode<synchronous>, transform_indices = @transform_2, window_bounds = array<i64: 8, 384>}, {pipeline_mode = #tpu.pipeline_mode<synchronous>, transform_indices = @transform_3, window_bounds = array<i64: 1, 384>}, {pipeline_mode = #tpu.pipeline_mode<synchronous>, transform_indices = @transform_4, window_bounds = array<i64: 128, 256>}, {pipeline_mode = #tpu.pipeline_mode<synchronous>, transform_indices = @transform_5, window_bounds = array<i64: 128, 128>}, {transform_indices = @transform_6, window_bounds = array<i64: 4, 16, 128>}]} {
    %c0_i32 = arith.constant 0 : i32
    %0 = arith.cmpi eq, %arg0, %c0_i32 : i32
    %1 = arith.extui %0 : i1 to i32
    %c0_i32_0 = arith.constant 0 : i32
    %2 = arith.cmpi ne, %1, %c0_i32_0 : i32
    scf.if %2 {
      %cst_72 = arith.constant 0.000000e+00 : f32
      %189 = vector.broadcast %cst_72 : f32 to vector<16x128xf32>
      %c0_73 = arith.constant 0 : index
      %c0_74 = arith.constant 0 : index
      %190 = vector.load %arg8[%c0_73, %c0_74] : memref<16x128xf32, #tpu.memory_space<vmem>>, vector<16x128xf32>
      tpu.vector_store %arg8[%c0_73, %c0_74], %189 {strides = array<i32>} : memref<16x128xf32, #tpu.memory_space<vmem>>, vector<16x128xf32>,
    } else {
    }
    %c0 = arith.constant 0 : index
    %c0_1 = arith.constant 0 : index
    %3 = vector.load %arg3[%c0, %c0_1] : memref<8x384xf32, #tpu.memory_space<vmem>>, vector<8x384xf32>
    %c0_2 = arith.constant 0 : index
    %c0_3 = arith.constant 0 : index
    %4 = vector.load %arg4[%c0_2, %c0_3] : memref<1x384xf32, #tpu.memory_space<vmem>>, vector<1x384xf32>
    %c0_4 = arith.constant 0 : index
    %c0_5 = arith.constant 0 : index
    %5 = vector.load %arg5[%c0_4, %c0_5] : memref<128x256xf32, #tpu.memory_space<vmem>>, vector<128x256xf32>
    %c0_6 = arith.constant 0 : index
    %c0_7 = arith.constant 0 : index
    %6 = vector.load %arg6[%c0_6, %c0_7] : memref<128x128xf32, #tpu.memory_space<vmem>>, vector<128x128xf32>
    %c0_8 = arith.constant 0 : index
    %c0_9 = arith.constant 0 : index
    %7 = vector.load %arg8[%c0_8, %c0_9] : memref<16x128xf32, #tpu.memory_space<vmem>>, vector<16x128xf32>
    %c0_i32_10 = arith.constant 0 : i32
    %8 = arith.index_cast %c0_i32_10 : i32 to index
    %c0_11 = arith.constant 0 : index
    %c0_12 = arith.constant 0 : index
    %9 = vector.load %arg1[%8, %c0_11, %c0_12] : memref<4x16x16xf32, #tpu.memory_space<vmem>>, vector<1x16x16xf32>
    %10 = vector.shape_cast %9 : vector<1x16x16xf32> to vector<16x16xf32>
    %11 = arith.index_cast %c0_i32_10 : i32 to index
    %c0_13 = arith.constant 0 : index
    %c0_14 = arith.constant 0 : index
    %12 = vector.load %arg2[%11, %c0_13, %c0_14] : memref<4x16x8xf32, #tpu.memory_space<vmem>>, vector<1x16x8xf32>
    %13 = vector.shape_cast %12 : vector<1x16x8xf32> to vector<16x8xf32>
    %cst = arith.constant dense<0.000000e+00> : vector<16x8xf32>
    %14 = tpu.matmul %10, %13, %cst {dimension_numbers = #tpu.dot_dimension_numbers<[1], [0], [0], [1], [0, 0, 1, 1], [], []>} : vector<16x16xf32>, vector<16x8xf32>, vector<16x8xf32> -> vector<16x8xf32>
    %cst_15 = arith.constant dense<0.000000e+00> : vector<16x384xf32>
    %15 = tpu.matmul %14, %3, %cst_15 {dimension_numbers = #tpu.dot_dimension_numbers<[1], [0], [0], [1], [0, 0, 1, 1], [], []>} : vector<16x8xf32>, vector<8x384xf32>, vector<16x384xf32> -> vector<16x384xf32>
    %16 = vector.broadcast %4 : vector<1x384xf32> to vector<16x384xf32>
    %17 = arith.addf %15, %16 : vector<16x384xf32>
    %cst_16 = arith.constant dense<0.000000e+00> : vector<16x128xf32>
    %18 = tpu.matmul %10, %7, %cst_16 {dimension_numbers = #tpu.dot_dimension_numbers<[1], [0], [0], [1], [0, 0, 1, 1], [], []>} : vector<16x16xf32>, vector<16x128xf32>, vector<16x128xf32> -> vector<16x128xf32>
    %cst_17 = arith.constant dense<0.000000e+00> : vector<16x256xf32>
    %19 = tpu.matmul %18, %5, %cst_17 {dimension_numbers = #tpu.dot_dimension_numbers<[1], [0], [0], [1], [0, 0, 1, 1], [], []>} : vector<16x128xf32>, vector<128x256xf32>, vector<16x256xf32> -> vector<16x256xf32>
    %20 = vector.extract_strided_slice %17 {offsets = [0, 0], sizes = [16, 128], strides = [1, 1]} : vector<16x384xf32> to vector<16x128xf32>
    %21 = vector.extract_strided_slice %19 {offsets = [0, 0], sizes = [16, 128], strides = [1, 1]} : vector<16x256xf32> to vector<16x128xf32>
    %22 = arith.addf %20, %21 : vector<16x128xf32>
    %23 = arith.negf %22 : vector<16x128xf32>
    %24 = math.exp %23 : vector<16x128xf32>
    %cst_18 = arith.constant 1.000000e+00 : f32
    %25 = vector.broadcast %cst_18 : f32 to vector<16x128xf32>
    %26 = arith.addf %25, %24 : vector<16x128xf32>
    %27 = arith.divf %25, %26 : vector<16x128xf32>
    %28 = vector.extract_strided_slice %17 {offsets = [0, 128], sizes = [16, 128], strides = [1, 1]} : vector<16x384xf32> to vector<16x128xf32>
    %29 = vector.extract_strided_slice %19 {offsets = [0, 128], sizes = [16, 128], strides = [1, 1]} : vector<16x256xf32> to vector<16x128xf32>
    %30 = arith.addf %28, %29 : vector<16x128xf32>
    %31 = arith.negf %30 : vector<16x128xf32>
    %32 = math.exp %31 : vector<16x128xf32>
    %cst_19 = arith.constant 1.000000e+00 : f32
    %33 = vector.broadcast %cst_19 : f32 to vector<16x128xf32>
    %34 = arith.addf %33, %32 : vector<16x128xf32>
    %35 = arith.divf %33, %34 : vector<16x128xf32>
    %36 = arith.mulf %35, %7 : vector<16x128xf32>
    %cst_20 = arith.constant dense<0.000000e+00> : vector<16x128xf32>
    %37 = tpu.matmul %10, %36, %cst_20 {dimension_numbers = #tpu.dot_dimension_numbers<[1], [0], [0], [1], [0, 0, 1, 1], [], []>} : vector<16x16xf32>, vector<16x128xf32>, vector<16x128xf32> -> vector<16x128xf32>
    %cst_21 = arith.constant dense<0.000000e+00> : vector<16x128xf32>
    %38 = tpu.matmul %37, %6, %cst_21 {dimension_numbers = #tpu.dot_dimension_numbers<[1], [0], [0], [1], [0, 0, 1, 1], [], []>} : vector<16x128xf32>, vector<128x128xf32>, vector<16x128xf32> -> vector<16x128xf32>
    %39 = vector.extract_strided_slice %17 {offsets = [0, 256], sizes = [16, 128], strides = [1, 1]} : vector<16x384xf32> to vector<16x128xf32>
    %40 = arith.addf %39, %38 : vector<16x128xf32>
    %41 = math.tanh %40 : vector<16x128xf32>
    %42 = vector.extract_strided_slice %7 {offsets = [0, 0], sizes = [1, 128], strides = [1, 1]} : vector<16x128xf32> to vector<1x128xf32>
    %43 = vector.broadcast %42 : vector<1x128xf32> to vector<16x128xf32>
    %44 = arith.mulf %27, %43 : vector<16x128xf32>
    %cst_22 = arith.constant 1.000000e+00 : f32
    %45 = vector.broadcast %cst_22 : f32 to vector<16x128xf32>
    %46 = arith.subf %45, %27 : vector<16x128xf32>
    %47 = arith.mulf %46, %41 : vector<16x128xf32>
    %48 = arith.addf %44, %47 : vector<16x128xf32>
    %49 = arith.index_cast %c0_i32_10 : i32 to index
    %c0_23 = arith.constant 0 : index
    %c0_24 = arith.constant 0 : index
    %50 = vector.load %arg7[%49, %c0_23, %c0_24] : memref<4x16x128xf32, #tpu.memory_space<vmem>>, vector<1x16x128xf32>
    %51 = vector.shape_cast %50 : vector<1x16x128xf32> to vector<16x128xf32>
    %52 = vector.shape_cast %48 : vector<16x128xf32> to vector<1x16x128xf32>
    tpu.vector_store %arg7[%49, %c0_23, %c0_24], %52 {strides = array<i32>} : memref<4x16x128xf32, #tpu.memory_space<vmem>>, vector<1x16x128xf32>,
    %c1_i32 = arith.constant 1 : i32
    %53 = arith.index_cast %c1_i32 : i32 to index
    %c0_25 = arith.constant 0 : index
    %c0_26 = arith.constant 0 : index
    %54 = vector.load %arg1[%53, %c0_25, %c0_26] : memref<4x16x16xf32, #tpu.memory_space<vmem>>, vector<1x16x16xf32>
    %55 = vector.shape_cast %54 : vector<1x16x16xf32> to vector<16x16xf32>
    %56 = arith.index_cast %c1_i32 : i32 to index
    %c0_27 = arith.constant 0 : index
    %c0_28 = arith.constant 0 : index
    %57 = vector.load %arg2[%56, %c0_27, %c0_28] : memref<4x16x8xf32, #tpu.memory_space<vmem>>, vector<1x16x8xf32>
    %58 = vector.shape_cast %57 : vector<1x16x8xf32> to vector<16x8xf32>
    %cst_29 = arith.constant dense<0.000000e+00> : vector<16x8xf32>
    %59 = tpu.matmul %55, %58, %cst_29 {dimension_numbers = #tpu.dot_dimension_numbers<[1], [0], [0], [1], [0, 0, 1, 1], [], []>} : vector<16x16xf32>, vector<16x8xf32>, vector<16x8xf32> -> vector<16x8xf32>
    %cst_30 = arith.constant dense<0.000000e+00> : vector<16x384xf32>
    %60 = tpu.matmul %59, %3, %cst_30 {dimension_numbers = #tpu.dot_dimension_numbers<[1], [0], [0], [1], [0, 0, 1, 1], [], []>} : vector<16x8xf32>, vector<8x384xf32>, vector<16x384xf32> -> vector<16x384xf32>
    %61 = vector.broadcast %4 : vector<1x384xf32> to vector<16x384xf32>
    %62 = arith.addf %60, %61 : vector<16x384xf32>
    %cst_31 = arith.constant dense<0.000000e+00> : vector<16x128xf32>
    %63 = tpu.matmul %55, %48, %cst_31 {dimension_numbers = #tpu.dot_dimension_numbers<[1], [0], [0], [1], [0, 0, 1, 1], [], []>} : vector<16x16xf32>, vector<16x128xf32>, vector<16x128xf32> -> vector<16x128xf32>
    %cst_32 = arith.constant dense<0.000000e+00> : vector<16x256xf32>
    %64 = tpu.matmul %63, %5, %cst_32 {dimension_numbers = #tpu.dot_dimension_numbers<[1], [0], [0], [1], [0, 0, 1, 1], [], []>} : vector<16x128xf32>, vector<128x256xf32>, vector<16x256xf32> -> vector<16x256xf32>
    %65 = vector.extract_strided_slice %62 {offsets = [0, 0], sizes = [16, 128], strides = [1, 1]} : vector<16x384xf32> to vector<16x128xf32>
    %66 = vector.extract_strided_slice %64 {offsets = [0, 0], sizes = [16, 128], strides = [1, 1]} : vector<16x256xf32> to vector<16x128xf32>
    %67 = arith.addf %65, %66 : vector<16x128xf32>
    %68 = arith.negf %67 : vector<16x128xf32>
    %69 = math.exp %68 : vector<16x128xf32>
    %cst_33 = arith.constant 1.000000e+00 : f32
    %70 = vector.broadcast %cst_33 : f32 to vector<16x128xf32>
    %71 = arith.addf %70, %69 : vector<16x128xf32>
    %72 = arith.divf %70, %71 : vector<16x128xf32>
    %73 = vector.extract_strided_slice %62 {offsets = [0, 128], sizes = [16, 128], strides = [1, 1]} : vector<16x384xf32> to vector<16x128xf32>
    %74 = vector.extract_strided_slice %64 {offsets = [0, 128], sizes = [16, 128], strides = [1, 1]} : vector<16x256xf32> to vector<16x128xf32>
    %75 = arith.addf %73, %74 : vector<16x128xf32>
    %76 = arith.negf %75 : vector<16x128xf32>
    %77 = math.exp %76 : vector<16x128xf32>
    %cst_34 = arith.constant 1.000000e+00 : f32
    %78 = vector.broadcast %cst_34 : f32 to vector<16x128xf32>
    %79 = arith.addf %78, %77 : vector<16x128xf32>
    %80 = arith.divf %78, %79 : vector<16x128xf32>
    %81 = arith.mulf %80, %48 : vector<16x128xf32>
    %cst_35 = arith.constant dense<0.000000e+00> : vector<16x128xf32>
    %82 = tpu.matmul %55, %81, %cst_35 {dimension_numbers = #tpu.dot_dimension_numbers<[1], [0], [0], [1], [0, 0, 1, 1], [], []>} : vector<16x16xf32>, vector<16x128xf32>, vector<16x128xf32> -> vector<16x128xf32>
    %cst_36 = arith.constant dense<0.000000e+00> : vector<16x128xf32>
    %83 = tpu.matmul %82, %6, %cst_36 {dimension_numbers = #tpu.dot_dimension_numbers<[1], [0], [0], [1], [0, 0, 1, 1], [], []>} : vector<16x128xf32>, vector<128x128xf32>, vector<16x128xf32> -> vector<16x128xf32>
    %84 = vector.extract_strided_slice %62 {offsets = [0, 256], sizes = [16, 128], strides = [1, 1]} : vector<16x384xf32> to vector<16x128xf32>
    %85 = arith.addf %84, %83 : vector<16x128xf32>
    %86 = math.tanh %85 : vector<16x128xf32>
    %87 = vector.extract_strided_slice %48 {offsets = [0, 0], sizes = [1, 128], strides = [1, 1]} : vector<16x128xf32> to vector<1x128xf32>
    %88 = vector.broadcast %87 : vector<1x128xf32> to vector<16x128xf32>
    %89 = arith.mulf %72, %88 : vector<16x128xf32>
    %cst_37 = arith.constant 1.000000e+00 : f32
    %90 = vector.broadcast %cst_37 : f32 to vector<16x128xf32>
    %91 = arith.subf %90, %72 : vector<16x128xf32>
    %92 = arith.mulf %91, %86 : vector<16x128xf32>
    %93 = arith.addf %89, %92 : vector<16x128xf32>
    %94 = arith.index_cast %c1_i32 : i32 to index
    %c0_38 = arith.constant 0 : index
    %c0_39 = arith.constant 0 : index
    %95 = vector.load %arg7[%94, %c0_38, %c0_39] : memref<4x16x128xf32, #tpu.memory_space<vmem>>, vector<1x16x128xf32>
    %96 = vector.shape_cast %95 : vector<1x16x128xf32> to vector<16x128xf32>
    %97 = vector.shape_cast %93 : vector<16x128xf32> to vector<1x16x128xf32>
    tpu.vector_store %arg7[%94, %c0_38, %c0_39], %97 {strides = array<i32>} : memref<4x16x128xf32, #tpu.memory_space<vmem>>, vector<1x16x128xf32>,
    %c2_i32 = arith.constant 2 : i32
    %98 = arith.index_cast %c2_i32 : i32 to index
    %c0_40 = arith.constant 0 : index
    %c0_41 = arith.constant 0 : index
    %99 = vector.load %arg1[%98, %c0_40, %c0_41] : memref<4x16x16xf32, #tpu.memory_space<vmem>>, vector<1x16x16xf32>
    %100 = vector.shape_cast %99 : vector<1x16x16xf32> to vector<16x16xf32>
    %101 = arith.index_cast %c2_i32 : i32 to index
    %c0_42 = arith.constant 0 : index
    %c0_43 = arith.constant 0 : index
    %102 = vector.load %arg2[%101, %c0_42, %c0_43] : memref<4x16x8xf32, #tpu.memory_space<vmem>>, vector<1x16x8xf32>
    %103 = vector.shape_cast %102 : vector<1x16x8xf32> to vector<16x8xf32>
    %cst_44 = arith.constant dense<0.000000e+00> : vector<16x8xf32>
    %104 = tpu.matmul %100, %103, %cst_44 {dimension_numbers = #tpu.dot_dimension_numbers<[1], [0], [0], [1], [0, 0, 1, 1], [], []>} : vector<16x16xf32>, vector<16x8xf32>, vector<16x8xf32> -> vector<16x8xf32>
    %cst_45 = arith.constant dense<0.000000e+00> : vector<16x384xf32>
    %105 = tpu.matmul %104, %3, %cst_45 {dimension_numbers = #tpu.dot_dimension_numbers<[1], [0], [0], [1], [0, 0, 1, 1], [], []>} : vector<16x8xf32>, vector<8x384xf32>, vector<16x384xf32> -> vector<16x384xf32>
    %106 = vector.broadcast %4 : vector<1x384xf32> to vector<16x384xf32>
    %107 = arith.addf %105, %106 : vector<16x384xf32>
    %cst_46 = arith.constant dense<0.000000e+00> : vector<16x128xf32>
    %108 = tpu.matmul %100, %93, %cst_46 {dimension_numbers = #tpu.dot_dimension_numbers<[1], [0], [0], [1], [0, 0, 1, 1], [], []>} : vector<16x16xf32>, vector<16x128xf32>, vector<16x128xf32> -> vector<16x128xf32>
    %cst_47 = arith.constant dense<0.000000e+00> : vector<16x256xf32>
    %109 = tpu.matmul %108, %5, %cst_47 {dimension_numbers = #tpu.dot_dimension_numbers<[1], [0], [0], [1], [0, 0, 1, 1], [], []>} : vector<16x128xf32>, vector<128x256xf32>, vector<16x256xf32> -> vector<16x256xf32>
    %110 = vector.extract_strided_slice %107 {offsets = [0, 0], sizes = [16, 128], strides = [1, 1]} : vector<16x384xf32> to vector<16x128xf32>
    %111 = vector.extract_strided_slice %109 {offsets = [0, 0], sizes = [16, 128], strides = [1, 1]} : vector<16x256xf32> to vector<16x128xf32>
    %112 = arith.addf %110, %111 : vector<16x128xf32>
    %113 = arith.negf %112 : vector<16x128xf32>
    %114 = math.exp %113 : vector<16x128xf32>
    %cst_48 = arith.constant 1.000000e+00 : f32
    %115 = vector.broadcast %cst_48 : f32 to vector<16x128xf32>
    %116 = arith.addf %115, %114 : vector<16x128xf32>
    %117 = arith.divf %115, %116 : vector<16x128xf32>
    %118 = vector.extract_strided_slice %107 {offsets = [0, 128], sizes = [16, 128], strides = [1, 1]} : vector<16x384xf32> to vector<16x128xf32>
    %119 = vector.extract_strided_slice %109 {offsets = [0, 128], sizes = [16, 128], strides = [1, 1]} : vector<16x256xf32> to vector<16x128xf32>
    %120 = arith.addf %118, %119 : vector<16x128xf32>
    %121 = arith.negf %120 : vector<16x128xf32>
    %122 = math.exp %121 : vector<16x128xf32>
    %cst_49 = arith.constant 1.000000e+00 : f32
    %123 = vector.broadcast %cst_49 : f32 to vector<16x128xf32>
    %124 = arith.addf %123, %122 : vector<16x128xf32>
    %125 = arith.divf %123, %124 : vector<16x128xf32>
    %126 = arith.mulf %125, %93 : vector<16x128xf32>
    %cst_50 = arith.constant dense<0.000000e+00> : vector<16x128xf32>
    %127 = tpu.matmul %100, %126, %cst_50 {dimension_numbers = #tpu.dot_dimension_numbers<[1], [0], [0], [1], [0, 0, 1, 1], [], []>} : vector<16x16xf32>, vector<16x128xf32>, vector<16x128xf32> -> vector<16x128xf32>
    %cst_51 = arith.constant dense<0.000000e+00> : vector<16x128xf32>
    %128 = tpu.matmul %127, %6, %cst_51 {dimension_numbers = #tpu.dot_dimension_numbers<[1], [0], [0], [1], [0, 0, 1, 1], [], []>} : vector<16x128xf32>, vector<128x128xf32>, vector<16x128xf32> -> vector<16x128xf32>
    %129 = vector.extract_strided_slice %107 {offsets = [0, 256], sizes = [16, 128], strides = [1, 1]} : vector<16x384xf32> to vector<16x128xf32>
    %130 = arith.addf %129, %128 : vector<16x128xf32>
    %131 = math.tanh %130 : vector<16x128xf32>
    %132 = vector.extract_strided_slice %93 {offsets = [0, 0], sizes = [1, 128], strides = [1, 1]} : vector<16x128xf32> to vector<1x128xf32>
    %133 = vector.broadcast %132 : vector<1x128xf32> to vector<16x128xf32>
    %134 = arith.mulf %117, %133 : vector<16x128xf32>
    %cst_52 = arith.constant 1.000000e+00 : f32
    %135 = vector.broadcast %cst_52 : f32 to vector<16x128xf32>
    %136 = arith.subf %135, %117 : vector<16x128xf32>
    %137 = arith.mulf %136, %131 : vector<16x128xf32>
    %138 = arith.addf %134, %137 : vector<16x128xf32>
    %139 = arith.index_cast %c2_i32 : i32 to index
    %c0_53 = arith.constant 0 : index
    %c0_54 = arith.constant 0 : index
    %140 = vector.load %arg7[%139, %c0_53, %c0_54] : memref<4x16x128xf32, #tpu.memory_space<vmem>>, vector<1x16x128xf32>
    %141 = vector.shape_cast %140 : vector<1x16x128xf32> to vector<16x128xf32>
    %142 = vector.shape_cast %138 : vector<16x128xf32> to vector<1x16x128xf32>
    tpu.vector_store %arg7[%139, %c0_53, %c0_54], %142 {strides = array<i32>} : memref<4x16x128xf32, #tpu.memory_space<vmem>>, vector<1x16x128xf32>,
    %c3_i32 = arith.constant 3 : i32
    %143 = arith.index_cast %c3_i32 : i32 to index
    %c0_55 = arith.constant 0 : index
    %c0_56 = arith.constant 0 : index
    %144 = vector.load %arg1[%143, %c0_55, %c0_56] : memref<4x16x16xf32, #tpu.memory_space<vmem>>, vector<1x16x16xf32>
    %145 = vector.shape_cast %144 : vector<1x16x16xf32> to vector<16x16xf32>
    %146 = arith.index_cast %c3_i32 : i32 to index
    %c0_57 = arith.constant 0 : index
    %c0_58 = arith.constant 0 : index
    %147 = vector.load %arg2[%146, %c0_57, %c0_58] : memref<4x16x8xf32, #tpu.memory_space<vmem>>, vector<1x16x8xf32>
    %148 = vector.shape_cast %147 : vector<1x16x8xf32> to vector<16x8xf32>
    %cst_59 = arith.constant dense<0.000000e+00> : vector<16x8xf32>
    %149 = tpu.matmul %145, %148, %cst_59 {dimension_numbers = #tpu.dot_dimension_numbers<[1], [0], [0], [1], [0, 0, 1, 1], [], []>} : vector<16x16xf32>, vector<16x8xf32>, vector<16x8xf32> -> vector<16x8xf32>
    %cst_60 = arith.constant dense<0.000000e+00> : vector<16x384xf32>
    %150 = tpu.matmul %149, %3, %cst_60 {dimension_numbers = #tpu.dot_dimension_numbers<[1], [0], [0], [1], [0, 0, 1, 1], [], []>} : vector<16x8xf32>, vector<8x384xf32>, vector<16x384xf32> -> vector<16x384xf32>
    %151 = vector.broadcast %4 : vector<1x384xf32> to vector<16x384xf32>
    %152 = arith.addf %150, %151 : vector<16x384xf32>
    %cst_61 = arith.constant dense<0.000000e+00> : vector<16x128xf32>
    %153 = tpu.matmul %145, %138, %cst_61 {dimension_numbers = #tpu.dot_dimension_numbers<[1], [0], [0], [1], [0, 0, 1, 1], [], []>} : vector<16x16xf32>, vector<16x128xf32>, vector<16x128xf32> -> vector<16x128xf32>
    %cst_62 = arith.constant dense<0.000000e+00> : vector<16x256xf32>
    %154 = tpu.matmul %153, %5, %cst_62 {dimension_numbers = #tpu.dot_dimension_numbers<[1], [0], [0], [1], [0, 0, 1, 1], [], []>} : vector<16x128xf32>, vector<128x256xf32>, vector<16x256xf32> -> vector<16x256xf32>
    %155 = vector.extract_strided_slice %152 {offsets = [0, 0], sizes = [16, 128], strides = [1, 1]} : vector<16x384xf32> to vector<16x128xf32>
    %156 = vector.extract_strided_slice %154 {offsets = [0, 0], sizes = [16, 128], strides = [1, 1]} : vector<16x256xf32> to vector<16x128xf32>
    %157 = arith.addf %155, %156 : vector<16x128xf32>
    %158 = arith.negf %157 : vector<16x128xf32>
    %159 = math.exp %158 : vector<16x128xf32>
    %cst_63 = arith.constant 1.000000e+00 : f32
    %160 = vector.broadcast %cst_63 : f32 to vector<16x128xf32>
    %161 = arith.addf %160, %159 : vector<16x128xf32>
    %162 = arith.divf %160, %161 : vector<16x128xf32>
    %163 = vector.extract_strided_slice %152 {offsets = [0, 128], sizes = [16, 128], strides = [1, 1]} : vector<16x384xf32> to vector<16x128xf32>
    %164 = vector.extract_strided_slice %154 {offsets = [0, 128], sizes = [16, 128], strides = [1, 1]} : vector<16x256xf32> to vector<16x128xf32>
    %165 = arith.addf %163, %164 : vector<16x128xf32>
    %166 = arith.negf %165 : vector<16x128xf32>
    %167 = math.exp %166 : vector<16x128xf32>
    %cst_64 = arith.constant 1.000000e+00 : f32
    %168 = vector.broadcast %cst_64 : f32 to vector<16x128xf32>
    %169 = arith.addf %168, %167 : vector<16x128xf32>
    %170 = arith.divf %168, %169 : vector<16x128xf32>
    %171 = arith.mulf %170, %138 : vector<16x128xf32>
    %cst_65 = arith.constant dense<0.000000e+00> : vector<16x128xf32>
    %172 = tpu.matmul %145, %171, %cst_65 {dimension_numbers = #tpu.dot_dimension_numbers<[1], [0], [0], [1], [0, 0, 1, 1], [], []>} : vector<16x16xf32>, vector<16x128xf32>, vector<16x128xf32> -> vector<16x128xf32>
    %cst_66 = arith.constant dense<0.000000e+00> : vector<16x128xf32>
    %173 = tpu.matmul %172, %6, %cst_66 {dimension_numbers = #tpu.dot_dimension_numbers<[1], [0], [0], [1], [0, 0, 1, 1], [], []>} : vector<16x128xf32>, vector<128x128xf32>, vector<16x128xf32> -> vector<16x128xf32>
    %174 = vector.extract_strided_slice %152 {offsets = [0, 256], sizes = [16, 128], strides = [1, 1]} : vector<16x384xf32> to vector<16x128xf32>
    %175 = arith.addf %174, %173 : vector<16x128xf32>
    %176 = math.tanh %175 : vector<16x128xf32>
    %177 = vector.extract_strided_slice %138 {offsets = [0, 0], sizes = [1, 128], strides = [1, 1]} : vector<16x128xf32> to vector<1x128xf32>
    %178 = vector.broadcast %177 : vector<1x128xf32> to vector<16x128xf32>
    %179 = arith.mulf %162, %178 : vector<16x128xf32>
    %cst_67 = arith.constant 1.000000e+00 : f32
    %180 = vector.broadcast %cst_67 : f32 to vector<16x128xf32>
    %181 = arith.subf %180, %162 : vector<16x128xf32>
    %182 = arith.mulf %181, %176 : vector<16x128xf32>
    %183 = arith.addf %179, %182 : vector<16x128xf32>
    %184 = arith.index_cast %c3_i32 : i32 to index
    %c0_68 = arith.constant 0 : index
    %c0_69 = arith.constant 0 : index
    %185 = vector.load %arg7[%184, %c0_68, %c0_69] : memref<4x16x128xf32, #tpu.memory_space<vmem>>, vector<1x16x128xf32>
    %186 = vector.shape_cast %185 : vector<1x16x128xf32> to vector<16x128xf32>
    %187 = vector.shape_cast %183 : vector<16x128xf32> to vector<1x16x128xf32>
    tpu.vector_store %arg7[%184, %c0_68, %c0_69], %187 {strides = array<i32>} : memref<4x16x128xf32, #tpu.memory_space<vmem>>, vector<1x16x128xf32>,
    %c4_i32 = arith.constant 4 : i32
    %c0_70 = arith.constant 0 : index
    %c0_71 = arith.constant 0 : index
    %188 = vector.load %arg8[%c0_70, %c0_71] : memref<16x128xf32, #tpu.memory_space<vmem>>, vector<16x128xf32>
    tpu.vector_store %arg8[%c0_70, %c0_71], %183 {strides = array<i32>} : memref<16x128xf32, #tpu.memory_space<vmem>>, vector<16x128xf32>,
    return
  }
  func.func @transform_0(%arg0: i32) -> (i32, i32, i32) {
    %c0_i32 = arith.constant 0 : i32
    %c0_i32_0 = arith.constant 0 : i32
    %c0_i32_1 = arith.constant 0 : i32
    return %arg0, %c0_i32, %c0_i32_0 : i32, i32, i32
  }
  func.func @transform_1(%arg0: i32) -> (i32, i32, i32) {
    %c0_i32 = arith.constant 0 : i32
    %c0_i32_0 = arith.constant 0 : i32
    %c0_i32_1 = arith.constant 0 : i32
    return %arg0, %c0_i32, %c0_i32_0 : i32, i32, i32
  }
  func.func @transform_2(%arg0: i32) -> (i32, i32) {
    %c0_i32 = arith.constant 0 : i32
    %c0_i32_0 = arith.constant 0 : i32
    %c0_i32_1 = arith.constant 0 : i32
    return %c0_i32, %c0_i32_0 : i32, i32
  }
  func.func @transform_3(%arg0: i32) -> (i32, i32) {
    %c0_i32 = arith.constant 0 : i32
    %c0_i32_0 = arith.constant 0 : i32
    %c0_i32_1 = arith.constant 0 : i32
    return %c0_i32, %c0_i32_0 : i32, i32
  }
  func.func @transform_4(%arg0: i32) -> (i32, i32) {
    %c0_i32 = arith.constant 0 : i32
    %c0_i32_0 = arith.constant 0 : i32
    %c0_i32_1 = arith.constant 0 : i32
    return %c0_i32, %c0_i32_0 : i32, i32
  }
  func.func @transform_5(%arg0: i32) -> (i32, i32) {
    %c0_i32 = arith.constant 0 : i32
    %c0_i32_0 = arith.constant 0 : i32
    %c0_i32_1 = arith.constant 0 : i32
    return %c0_i32, %c0_i32_0 : i32, i32
  }
  func.func @transform_6(%arg0: i32) -> (i32, i32, i32) {
    %c0_i32 = arith.constant 0 : i32
    %c0_i32_0 = arith.constant 0 : i32
    %c0_i32_1 = arith.constant 0 : i32
    return %arg0, %c0_i32, %c0_i32_0 : i32, i32, i32
  }
}

</mosaic_0001>

<bundles_post_ra>
// kernel: tpu_custom_call.1
= control target key start
LH: loop header
LB: loop body
LE: loop exit
PB: predicated region body
PF: predicated region fallthrough
CT: control target
= control target key end

     0   :  { %11 = vsyncpa [#allocation4], 0  ;;  %s3825_s0 = inlined_call_operand.vmem [shape: f32[4,16,16], index: 0, kind: input, shape index: {}]   ;;  %s3826_s1 = inlined_call_operand.vmem [shape: f32[4,16,8], index: 1, kind: input, shape index: {}]   ;;  %s3827_s2 = inlined_call_operand.vmem [shape: f32[8,384], index: 2, kind: input, shape index: {}]   ;;  %s3828_s3 = inlined_call_operand.vmem [shape: f32[1,384], index: 3, kind: input, shape index: {}]   ;;  %s3829_s4 = inlined_call_operand.hbm [shape: f32[128,256], index: 4, kind: input, shape index: {}]   ;;  %s3830_s5 = inlined_call_operand.hbm [shape: f32[128,128], index: 5, kind: input, shape index: {}]   ;;  %s3831_s6 = inlined_call_operand.hbm [shape: f32[4,16,128], index: 6, kind: output, shape index: {}]  }
   0x1   :  { %12 = vsyncpa [#allocation7], 0 }
   0x2   :  { %13 = vsyncpa [#allocation5], 0  ;;  %s3171_s21 = smov [#allocation3]  }
   0x3   :  { %s27_s22 = sshll.u32 %s3171_s21, 4  ;;  %s28_s22 = int_to_ptr.vmem [resolvable:$true] %s27_s22 }
   0x4   :  { %s3113_s23 = scalar_lea.vmem %s28_s22, 4096  ;;  %p3118_p1 = scmp.lt.s32.totalorder %s28_s22, %s28_s22 }
   0x5   :  { %p3114_p0 = scmp.ne.s32.totalorder %s28_s22, %s3113_s23  ;;  %p3119_p2 = scmp.lt.s32.totalorder %s3113_s23, %s3113_s23 }
   0x7   :  { %p3120_p3 = por %p3119_p2, %p3118_p1 }
   0x9   :  { %p3121_p4 = pnand %p3120_p3, %p3114_p0 }
   0xb   :  { %3124 = shalt.err (!%p3121_p4)
}
   0xc   :  { %s3172_s24 = smov 256   ;;  %s3173_s25 = smov 16  }
   0xd   :  { %33 = dma.hbm_to_vmem [thread:$0]  %s3829_s4, 4096, %s28_s22, [#allocation4], %s3172_s24, %s3172_s24, %s3173_s25  }
   0xe   :  { %s3174_s28 = smov [#allocation6]  }
   0xf   :  { %s39_s29 = sshll.u32 %s3174_s28, 4  ;;  %s40_s29 = int_to_ptr.vmem [resolvable:$true] %s39_s29 }
  0x10   :  { %s3133_s30 = scalar_lea.vmem %s40_s29, 2048  ;;  %p3138_p6 = scmp.lt.s32.totalorder %s40_s29, %s40_s29 }
  0x11   :  { %p3134_p5 = scmp.ne.s32.totalorder %s40_s29, %s3133_s30  ;;  %p3139_p7 = scmp.lt.s32.totalorder %s3133_s30, %s3133_s30 }
  0x13   :  { %p3140_p8 = por %p3139_p7, %p3138_p6 }
  0x15   :  { %p3141_p9 = pnand %p3140_p8, %p3134_p5 }
  0x17   :  { %3144 = shalt.err (!%p3141_p9)
}
  0x18   :  { %s3175_s7 = smov 128   ;;  %s3176_s8 = smov 8  }
  0x19   :  { %45 = dma.hbm_to_vmem [thread:$0]  %s3830_s5, 2048, %s40_s29, [#allocation7], %s3175_s7, %s3175_s7, %s3176_s8  }
  0x1a   :  { %3165 = dma.done.wait [#allocation4], 4096  }
  0x1b   :  { %3166 = vsyncadd [#allocation4], 4294963200 }
  0x1c   :  { %3167 = dma.done.wait [#allocation7], 2048  }
  0x1d   :  { %3168 = vsyncadd [#allocation7], 4294965248  ;;  %vm116_vm0 = vcmask 130048   ;;  %v115_v0 = vld [vmem:[%s3826_s1 + $0x8] sm:$0xff]  ;;  %v114_v1 = vld [vmem:[%s3826_s1] sm:$0xff]  ;;  %v3832_v6 = vmov 0.0   ;;  %v199_v50 = vlaneseq }
  0x1e   :  { %v3232_v2 = vld [vmem:[%s3825_s0] sm:$0xff]  ;;  %2730 = vmatprep.subr.mxu0 %v115_v0  ;;  %v3239_v3 = vld [vmem:[%s3825_s0 + $0x8] sm:$0xff]  ;;  %285 = vmatprep.mubr.f32.mxu1 %v3832_v6  ;;  %v3259_v7 = vld [vmem:[%s3827_s2 + $0x10] sm:$0xff]  ;;  %vm214_vm1 = vcmask 64512  }
  0x1f   :  { %2734 = vmatprep.mubr.msk.f32.mxu0 %vm116_vm0, %v3232_v2  ;;  %2731 = vmatpush3.msra.mxu0 %v115_v0  ;;  %v3246_v4 = vld [vmem:[%s3827_s2 + $0x8] sm:$0xff]  ;;  %v3252_v5 = vld [vmem:[%s3827_s2] sm:$0xff]  ;;  %v3263_v8 = vld [vmem:[#allocation3 + $0xf8] sm:$0xff]  ;;  %v3378_v51 = vshrl.u32 %v199_v50, 7 }
  0x20   :  { %2732 = vmatprep.subr.mxu0 %v114_v1  ;;  %3858 = vst [vmem:[#allocation12_spill] sm:$0xff] %v3246_v4  ;;  %251 = vmatprep.subr.mxu1 %v3246_v4  ;;  %v3265_v9 = vld [vmem:[#allocation3 + $0xf0] sm:$0xff]  ;;  %v3267_v10 = vld [vmem:[#allocation3 + $0xe8] sm:$0xff]  ;;  %v3270_v11 = vld [vmem:[#allocation3 + $0xe0] sm:$0xff] }
  0x21   :  { %2733 = vmatpush3.msra.mxu0 %v114_v1  ;;  %252 = vmatpush1.msra.mxu1 %v3252_v5  ;;  %v3273_v12 = vld [vmem:[#allocation3 + $0xd8] sm:$0xff]  ;;  %v3276_v13 = vld [vmem:[#allocation3 + $0xd0] sm:$0xff]  ;;  %v3279_v14 = vld [vmem:[#allocation3 + $0xc8] sm:$0xff]  ;;  %v3381_v52 = vsub.s32 0, %v3378_v51  ;;  %v205_v54 = vsub.s32 1, %v3378_v51 }
  0x22   :  { %2735 = vmatmul.mubr.msk.f32.vlgmr.msra.gmra.mxu0 %vm116_vm0, %v3239_v3  ;;  %2737 = vmatprep.subr.mxu1 %v3259_v7  ;;  %v3282_v15 = vld [vmem:[#allocation3 + $0xc0] sm:$0xff]  ;;  %v3285_v16 = vld [vmem:[#allocation3 + $0xb8] sm:$0xff]  ;;  %v3288_v17 = vld [vmem:[#allocation3 + $0xb0] sm:$0xff] }
  0x23   :  { %512 = vmatprep.mubr.f32.mxu0 %v3832_v6  ;;  %448 = vmatprep.subr.mxu0 %v3263_v8  ;;  %v3291_v18 = vld [vmem:[#allocation3 + $0xa8] sm:$0xff]  ;;  %v3294_v19 = vld [vmem:[#allocation3 + $0xa0] sm:$0xff]  ;;  %v3297_v20 = vld [vmem:[#allocation3 + $0x98] sm:$0xff]  ;;  %3868 = vst [vmem:[#allocation22_spill] sm:$0xff] %v3381_v52 }
  0x24   :  { %449 = vmatpush1.msra.mxu0 %v3265_v9  ;;  %v3300_v21 = vld [vmem:[#allocation3 + $0x90] sm:$0xff]  ;;  %v3303_v22 = vld [vmem:[#allocation3 + $0x88] sm:$0xff]  ;;  %v3306_v23 = vld [vmem:[#allocation3 + $0x80] sm:$0xff] }
  0x25   :  { %450 = vmatprep.subr.mxu0 %v3267_v10  ;;  %v3309_v24 = vld [vmem:[#allocation3 + $0x78] sm:$0xff]  ;;  %v3328_v27 = vld [vmem:[#allocation3 + $0x70] sm:$0xff]  ;;  %v3331_v28 = vld [vmem:[#allocation3 + $0x68] sm:$0xff] }
  0x26   :  { %451 = vmatpush1.msra.mxu0 %v3270_v11  ;;  %v3334_v29 = vld [vmem:[#allocation3 + $0x60] sm:$0xff]  ;;  %v3337_v30 = vld [vmem:[#allocation3 + $0x58] sm:$0xff]  ;;  %v3340_v31 = vld [vmem:[#allocation3 + $0x50] sm:$0xff] }
  0x27   :  { %452 = vmatprep.subr.mxu0 %v3273_v12  ;;  %v3343_v32 = vld [vmem:[#allocation3 + $0x48] sm:$0xff]  ;;  %v3346_v33 = vld [vmem:[#allocation3 + $0x40] sm:$0xff]  ;;  %v3349_v34 = vld [vmem:[#allocation3 + $0x38] sm:$0xff] }
  0x28   :  { %453 = vmatpush1.msra.mxu0 %v3276_v13  ;;  %3859 = vst [vmem:[#allocation13_spill] sm:$0xff] %v3346_v33  ;;  %3860 = vst [vmem:[#allocation14_spill] sm:$0xff] %v3349_v34  ;;  %v3352_v35 = vld [vmem:[#allocation3 + $0x30] sm:$0xff]  ;;  %v3355_v36 = vld [vmem:[#allocation3 + $0x28] sm:$0xff] }
  0x29   :  { %454 = vmatprep.subr.mxu0 %v3279_v14  ;;  %3861 = vst [vmem:[#allocation15_spill] sm:$0xff] %v3352_v35  ;;  %3862 = vst [vmem:[#allocation16_spill] sm:$0xff] %v3355_v36  ;;  %v3358_v37 = vld [vmem:[#allocation3 + $0x20] sm:$0xff]  ;;  %v3361_v38 = vld [vmem:[#allocation3 + $0x18] sm:$0xff] }
  0x2a   :  { %455 = vmatpush1.msra.mxu0 %v3282_v15  ;;  %3863 = vst [vmem:[#allocation17_spill] sm:$0xff] %v3358_v37  ;;  %3864 = vst [vmem:[#allocation18_spill] sm:$0xff] %v3361_v38  ;;  %v3364_v39 = vld [vmem:[#allocation3 + $0x10] sm:$0xff]  ;;  %v3367_v40 = vld [vmem:[#allocation3 + $0x8] sm:$0xff] }
  0x2b   :  { %456 = vmatprep.subr.mxu0 %v3285_v16  ;;  %3865 = vst [vmem:[#allocation19_spill] sm:$0xff] %v3364_v39  ;;  %3866 = vst [vmem:[#allocation20_spill] sm:$0xff] %v3367_v40  ;;  %v3370_v41 = vld [vmem:[#allocation3] sm:$0xff] }
  0x2c   :  { %457 = vmatpush1.msra.mxu0 %v3288_v17  ;;  %3867 = vst [vmem:[#allocation21_spill] sm:$0xff] %v3370_v41  ;;  %v3386_v53 = vld [vmem:[%s3828_s3] sm:$0x7] }
  0x2d   :  { %458 = vmatprep.subr.mxu0 %v3291_v18  ;;  %v3391_v55 = vrot.slane %v3386_v53, %v3381_v52  ;;  %v3394_v56 = vrot.slane %v3386_v53, %v205_v54 }
  0x2e   :  { %459 = vmatpush1.msra.mxu0 %v3294_v19 }
  0x2f   :  { %460 = vmatprep.subr.mxu0 %v3297_v20 }
  0x30   :  { %461 = vmatpush1.msra.mxu0 %v3300_v21 }
  0x31   :  { %462 = vmatprep.subr.mxu0 %v3303_v22 }
  0x32   :  { %463 = vmatpush1.msra.mxu0 %v3306_v23 }
  0x33   :  { %464 = vmatprep.subr.mxu0 %v3309_v24 }
  0x34   :  { %465 = vmatpush1.msra.mxu0 %v3328_v27 }
  0x35   :  { %466 = vmatprep.subr.mxu0 %v3331_v28 }
  0x36   :  { %467 = vmatpush1.msra.mxu0 %v3334_v29 }
  0x37   :  { %468 = vmatprep.subr.mxu0 %v3337_v30 }
  0x38   :  { %469 = vmatpush1.msra.mxu0 %v3340_v31 }
  0x39   :  { %470 = vmatprep.subr.mxu0 %v3343_v32 }
  0x3a   :  { %471 = vmatpush1.msra.mxu0 %v3346_v33 }
  0x3b   :  { %472 = vmatprep.subr.mxu0 %v3349_v34 }
  0x3c   :  { %473 = vmatpush1.msra.mxu0 %v3352_v35 }
  0x3d   :  { %474 = vmatprep.subr.mxu0 %v3355_v36 }
  0x3e   :  { %475 = vmatpush1.msra.mxu0 %v3358_v37 }
  0x3f   :  { %476 = vmatprep.subr.mxu0 %v3361_v38 }
  0x40   :  { %477 = vmatpush1.msra.mxu0 %v3364_v39 }
  0x41   :  { %478 = vmatprep.subr.mxu0 %v3367_v40 }
  0x42   :  { %479 = vmatpush1.msra.mxu0 %v3370_v41 }
  0xe2   :  { %v2736_v25 = vpop.f32.mrf.mxu0 }
  0xe4   :  { %v189_v26 = vpop.f32.mrf.mxu0 }
  0xe5   :  { %2533 = vmatmul.mubr.msk.f32.vlgmr.msra.gmra.mxu1 %vm214_vm1, %v189_v26 }
  0xe6   :  { %2738 = vmatpush3.msra.mxu1 %v3259_v7  ;;  %291 = vmatprep.mubr.f32.mxu1 %v3832_v6 }
  0xe7   :  { %2742 = vmatprep.subr.mxu1 %v3832_v6 }
  0xe9   :  { %2534 = vmatmul.mubr.msk.f32.gmra.mxu1 %vm214_vm1, %v2736_v25 }
  0xea   :  { %2739 = vmatprep.mubr.msk.f32.mxu1 %vm214_vm1, %v189_v26 }
  0xed   :  { %2740 = vmatmul.mubr.msk.f32.vlgmr.msra.gmra.mxu1 %vm214_vm1, %v2736_v25 }
  0xee   :  { %2743 = vmatpush3.msra.mxu1 %v3832_v6  ;;  %2744 = vmatprep.mubr.msk.f32.mxu1 %vm116_vm0, %v3232_v2 }
  0xf1   :  { %2745 = vmatmul.mubr.msk.f32.vlgmr.msra.gmra.mxu1 %vm116_vm0, %v3239_v3 }
  0xf2   :  { %2751 = vmatprep.mubr.msk.f32.mxu1 %vm116_vm0, %v3232_v2 }
 0x1a5   :  { %v287_v42 = vpop.f32.mrf.mxu1 }
 0x1a6   :  { %v288_v57 = vadd.f32 %v287_v42, %v3391_v55 }
 0x1a7   :  { %v289_v43 = vpop.f32.mrf.mxu1 }
 0x1a8   :  { %v290_v59 = vadd.f32 %v289_v43, %v3394_v56 }
 0x1a9   :  { %v293_v44 = vpop.f32.mrf.mxu1 }
 0x1aa   :  { %v294_v62 = vadd.f32 %v293_v44, %v3391_v55 }
 0x1ab   :  { %v295_v45 = vpop.f32.mrf.mxu1 }
 0x1ac   :  { %v296_v1 = vadd.f32 %v295_v45, %v3394_v56  ;;  %v3404_v45 = vld [vmem:[#allocation6 + $0x78] sm:$0xff] }
 0x1ad   :  { %v3373_v46 = vpop.f32.mrf.mxu1 }
 0x1af   :  { %v3375_v47 = vpop.f32.mrf.mxu1 }
 0x1b1   :  { %v2746_v48 = vpop.f32.mrf.mxu1 }
 0x1b3   :  { %v439_v49 = vpop.f32.mrf.mxu1 }
 0x1b4   :  { %513 = vmatmul.mubr.f32.vlgmr.msra.gmra.mxu0 %v439_v49 }
 0x1b5   :  { %518 = vmatprep.mubr.f32.mxu0 %v3832_v6  ;;  %v3487_v6 = vld [vmem:[%s3825_s0 + $0x18] sm:$0xff] }
 0x1b8   :  { %519 = vmatmul.mubr.f32.gmra.mxu0 %v2746_v48 }
 0x274   :  { %v514_v58 = vpop.f32.mrf.mxu0 }
 0x275   :  { %v3398_v60 = vadd.f32 %v514_v58, %v288_v57 }
 0x276   :  { %v516_v61 = vpop.f32.mrf.mxu0 }
 0x277   :  { %v539_v63 = vadd.f32 %v516_v61, %v290_v59  ;;  %v3406_v61 = vld [vmem:[#allocation6 + $0x70] sm:$0xff] }
 0x278   :  { %v520_v0 = vpop.f32.mrf.mxu0 }
 0x279   :  { %v2541_v2 = vmul.f32 -1.442695, %v539_v63  ;;  %v3402_v25 = vadd.f32 %v520_v0, %v294_v62  ;;  %v3412_v62 = vld [vmem:[#allocation6 + $0x68] sm:$0xff]  ;;  %v3416_v63 = vld [vmem:[#allocation6 + $0x60] sm:$0xff]  ;;  %v3420_v0 = vld [vmem:[#allocation6 + $0x58] sm:$0xff] }
 0x27a   :  { %v522_v26 = vpop.f32.mrf.mxu0 }
 0x27b   :  { %2980 = vpow2.f32 %v2541_v2  ;;  %v540_v48 = vadd.f32 %v522_v26, %v296_v1  ;;  %v3428_v1 = vld [vmem:[#allocation6 + $0x48] sm:$0xff]  ;;  %v3432_v2 = vld [vmem:[#allocation6 + $0x40] sm:$0xff]  ;;  %v3436_v26 = vld [vmem:[#allocation6 + $0x38] sm:$0xff] }
 0x27d   :  { %v2542_v49 = vmul.f32 -1.442695, %v540_v48  ;;  %v3440_v48 = vld [vmem:[#allocation6 + $0x30] sm:$0xff] }
 0x27f   :  { %2982 = vpow2.f32 %v2542_v49  ;;  %v3444_v49 = vld [vmem:[#allocation6 + $0x28] sm:$0xff] }
 0x288   :  { %v2981_v42 = vpop.eup %2980 }
 0x289   :  { %v547_v50 = vadd.f32 1.0, %v2981_v42  ;;  %v3448_v42 = vld [vmem:[#allocation6 + $0x20] sm:$0xff] }
 0x28b   :  { %2984 = vrcp.f32 %v547_v50  ;;  %v3452_v50 = vld [vmem:[#allocation6 + $0x18] sm:$0xff] }
 0x28c   :  { %v2983_v43 = vpop.eup %2982 }
 0x28d   :  { %v548_v54 = vadd.f32 1.0, %v2983_v43  ;;  %v3456_v43 = vld [vmem:[#allocation6 + $0x10] sm:$0xff] }
 0x28e   :  { %3869 = vst [vmem:[#allocation23_spill] sm:$0xff] %v3456_v43 }
 0x28f   :  { %2986 = vrcp.f32 %v548_v54  ;;  %v3462_v54 = vld [vmem:[#allocation6 + $0x8] sm:$0xff] }
 0x290   :  { %3870 = vst [vmem:[#allocation24_spill] sm:$0xff] %v3462_v54 }
 0x298   :  { %v2985_v57 = vpop.eup %2984 }
 0x299   :  { %v553_v59 = vmul.f32 0.0, %v2985_v57  ;;  %v3466_v57 = vld [vmem:[#allocation6] sm:$0xff] }
 0x29a   :  { %3871 = vst [vmem:[#allocation25_spill] sm:$0xff] %v3466_v57 }
 0x29c   :  { %v2987_v44 = vpop.eup %2986 }
 0x29d   :  { %v554_v58 = vmul.f32 0.0, %v2987_v44  ;;  %v2548_v44 = vld [vmem:[%s3826_s1 + $0x18] sm:$0xff] }
 0x29e   :  { %2789 = vmatprep.subr.mxu0 %v2548_v44 }
 0x29f   :  { %2747 = vmatprep.subr.mxu1 %v554_v58  ;;  %2790 = vmatpush3.msra.mxu0 %v2548_v44  ;;  %v3872_v44 = vmov 0.0  }
 0x2a0   :  { %2748 = vmatpush3.msra.mxu1 %v554_v58  ;;  %v2547_v58 = vld [vmem:[%s3826_s1 + $0x10] sm:$0xff] }
 0x2a1   :  { %2749 = vmatprep.subr.mxu1 %v553_v59  ;;  %2791 = vmatprep.subr.mxu0 %v2547_v58 }
 0x2a2   :  { %2750 = vmatpush3.msra.mxu1 %v553_v59  ;;  %v3479_v59 = vld [vmem:[%s3825_s0 + $0x10] sm:$0xff]  ;;  %2792 = vmatpush3.msra.mxu0 %v2547_v58 }
 0x2a3   :  { %2752 = vmatmul.mubr.msk.f32.vlgmr.msra.gmra.mxu1 %vm116_vm0, %v3239_v3  ;;  %2754 = vmatprep.subr.mxu1 %v3404_v45  ;;  %v3424_v3 = vld [vmem:[#allocation6 + $0x50] sm:$0xff] }
 0x2a4   :  { %2755 = vmatpush3.msra.mxu1 %v3404_v45  ;;  %2793 = vmatprep.mubr.msk.f32.mxu0 %vm116_vm0, %v3479_v59 }
 0x2a5   :  { %2756 = vmatprep.subr.mxu1 %v3406_v61  ;;  %2794 = vmatmul.mubr.msk.f32.vlgmr.msra.gmra.mxu0 %vm116_vm0, %v3487_v6 }
 0x2a6   :  { %2757 = vmatpush3.msra.mxu1 %v3406_v61  ;;  %2796 = vmatprep.subr.mxu0 %v3259_v7 }
 0x2a7   :  { %2758 = vmatprep.subr.mxu1 %v3412_v62  ;;  %2797 = vmatpush3.msra.mxu0 %v3259_v7 }
 0x2a8   :  { %2759 = vmatpush3.msra.mxu1 %v3412_v62 }
 0x2a9   :  { %2760 = vmatprep.subr.mxu1 %v3416_v63 }
 0x2aa   :  { %2761 = vmatpush3.msra.mxu1 %v3416_v63 }
 0x2ab   :  { %2762 = vmatprep.subr.mxu1 %v3420_v0 }
 0x2ac   :  { %2763 = vmatpush3.msra.mxu1 %v3420_v0 }
 0x2ad   :  { %2764 = vmatprep.subr.mxu1 %v3424_v3 }
 0x2ae   :  { %2765 = vmatpush3.msra.mxu1 %v3424_v3 }
 0x2af   :  { %2766 = vmatprep.subr.mxu1 %v3428_v1 }
 0x2b0   :  { %2767 = vmatpush3.msra.mxu1 %v3428_v1 }
 0x2b1   :  { %2768 = vmatprep.subr.mxu1 %v3432_v2 }
 0x2b2   :  { %2769 = vmatpush3.msra.mxu1 %v3432_v2 }
 0x2b3   :  { %2770 = vmatprep.subr.mxu1 %v3436_v26 }
 0x2b4   :  { %2771 = vmatpush3.msra.mxu1 %v3436_v26 }
 0x2b5   :  { %2772 = vmatprep.subr.mxu1 %v3440_v48 }
 0x2b6   :  { %2773 = vmatpush3.msra.mxu1 %v3440_v48 }
 0x2b7   :  { %2774 = vmatprep.subr.mxu1 %v3444_v49 }
 0x2b8   :  { %2775 = vmatpush3.msra.mxu1 %v3444_v49 }
 0x2b9   :  { %2776 = vmatprep.subr.mxu1 %v3448_v42 }
 0x2ba   :  { %2777 = vmatpush3.msra.mxu1 %v3448_v42 }
 0x2bb   :  { %2778 = vmatprep.subr.mxu1 %v3452_v50 }
 0x2bc   :  { %2779 = vmatpush3.msra.mxu1 %v3452_v50 }
 0x2bd   :  { %2780 = vmatprep.subr.mxu1 %v3456_v43 }
 0x2be   :  { %2781 = vmatpush3.msra.mxu1 %v3456_v43 }
 0x2bf   :  { %2782 = vmatprep.subr.mxu1 %v3462_v54 }
 0x2c0   :  { %2783 = vmatpush3.msra.mxu1 %v3462_v54 }
 0x2c1   :  { %2784 = vmatprep.subr.mxu1 %v3466_v57 }
 0x2c2   :  { %2785 = vmatpush3.msra.mxu1 %v3466_v57 }
 0x2c3   :  { %846 = vmatprep.subr.mxu1 %v3246_v4 }
 0x363   :  { %v2753_v4 = vpop.f32.mrf.mxu1 }
 0x365   :  { %v621_v57 = vpop.f32.mrf.mxu1  ;;  %v2795_v54 = vpop.f32.mrf.mxu0 }
 0x366   :  { %2786 = vmatprep.mubr.f32.mxu1 %v621_v57 }
 0x367   :  { %2787 = vmatmul.mubr.f32.vlgmr.msra.gmra.mxu1 %v2753_v4  ;;  %v801_v43 = vpop.f32.mrf.mxu0  ;;  %v2540_v4 = vmul.f32 -1.442695, %v3402_v25 }
 0x368   :  { %847 = vmatpush1.msra.mxu1 %v3252_v5  ;;  %880 = vmatprep.mubr.f32.mxu1 %v3872_v44 }
 0x369   :  { %1043 = vmatprep.subr.mxu1 %v3263_v8  ;;  %2798 = vmatprep.mubr.msk.f32.mxu0 %vm214_vm1, %v801_v43  ;;  %2988 = vpow2.f32 %v2540_v4 }
 0x36a   :  { %2799 = vmatmul.mubr.msk.f32.vlgmr.msra.gmra.mxu0 %vm214_vm1, %v2795_v54 }
 0x36b   :  { %2551 = vmatmul.mubr.msk.f32.vlgmr.msra.gmra.mxu1 %vm214_vm1, %v801_v43  ;;  %2805 = vmatprep.mubr.msk.f32.mxu0 %vm116_vm0, %v3479_v59  ;;  %v2539_v43 = vmul.f32 -1.442695, %v3398_v60 }
 0x36c   :  { %886 = vmatprep.mubr.f32.mxu1 %v3872_v44  ;;  %1044 = vmatpush1.msra.mxu1 %v3265_v9 }
 0x36d   :  { %1045 = vmatprep.subr.mxu1 %v3267_v10  ;;  %2990 = vpow2.f32 %v2539_v43 }
 0x36e   :  { %1046 = vmatpush1.msra.mxu1 %v3270_v11 }
 0x36f   :  { %2552 = vmatmul.mubr.msk.f32.gmra.mxu1 %vm214_vm1, %v2795_v54  ;;  %1047 = vmatprep.subr.mxu1 %v3273_v12  ;;  %v209_v54 = vsub.s32 2, %v3378_v51 }
 0x370   :  { %1107 = vmatprep.mubr.f32.mxu1 %v3872_v44  ;;  %1048 = vmatpush1.msra.mxu1 %v3276_v13 }
 0x371   :  { %1049 = vmatprep.subr.mxu1 %v3279_v14 }
 0x372   :  { %1050 = vmatpush1.msra.mxu1 %v3282_v15 }
 0x373   :  { %1051 = vmatprep.subr.mxu1 %v3285_v16 }
 0x374   :  { %1052 = vmatpush1.msra.mxu1 %v3288_v17 }
 0x375   :  { %1053 = vmatprep.subr.mxu1 %v3291_v18 }
 0x376   :  { %1054 = vmatpush1.msra.mxu1 %v3294_v19  ;;  %v2989_v57 = vpop.eup %2988 }
 0x377   :  { %1055 = vmatprep.subr.mxu1 %v3297_v20 }
 0x378   :  { %1056 = vmatpush1.msra.mxu1 %v3300_v21 }
 0x379   :  { %1057 = vmatprep.subr.mxu1 %v3303_v22 }
 0x37a   :  { %1058 = vmatpush1.msra.mxu1 %v3306_v23  ;;  %v2991_v58 = vpop.eup %2990 }
 0x37b   :  { %1059 = vmatprep.subr.mxu1 %v3309_v24 }
 0x37c   :  { %1060 = vmatpush1.msra.mxu1 %v3328_v27 }
 0x37d   :  { %1061 = vmatprep.subr.mxu1 %v3331_v28 }
 0x37e   :  { %1062 = vmatpush1.msra.mxu1 %v3334_v29 }
 0x37f   :  { %1063 = vmatprep.subr.mxu1 %v3337_v30 }
 0x380   :  { %1064 = vmatpush1.msra.mxu1 %v3340_v31 }
 0x381   :  { %1065 = vmatprep.subr.mxu1 %v3343_v32 }
 0x382   :  { %1066 = vmatpush1.msra.mxu1 %v3346_v33 }
 0x383   :  { %1067 = vmatprep.subr.mxu1 %v3349_v34 }
 0x384   :  { %1068 = vmatpush1.msra.mxu1 %v3352_v35 }
 0x385   :  { %1069 = vmatprep.subr.mxu1 %v3355_v36  ;;  %v533_v36 = vadd.f32 1.0, %v2991_v58 }
 0x386   :  { %1070 = vmatpush1.msra.mxu1 %v3358_v37  ;;  %v3539_v37 = vrot.slane %v3386_v53, %v209_v54  ;;  %v712_v53 = vrot.slane %v3872_v44, %v3381_v52 }
 0x387   :  { %1071 = vmatprep.subr.mxu1 %v3361_v38  ;;  %v534_v38 = vadd.f32 1.0, %v2989_v57 }
 0x388   :  { %1072 = vmatpush1.msra.mxu1 %v3364_v39  ;;  %v365_v25 = vadd.f32 %v3375_v47, %v3539_v37 }
 0x389   :  { %1073 = vmatprep.subr.mxu1 %v3367_v40  ;;  %v370_v40 = vadd.f32 %v3373_v46, %v3539_v37  ;;  %2992 = vrcp.f32 %v534_v38 }
 0x38a   :  { %1074 = vmatpush1.msra.mxu1 %v3370_v41  ;;  %2994 = vrcp.f32 %v533_v36 }
 0x396   :  { %v2993_v43 = vpop.eup %2992 }
 0x397   :  { %v2995_v39 = vpop.eup %2994  ;;  %v716_v54 = vsub.f32 1.0, %v2993_v43  ;;  %v714_v58 = vmul.f32 %v2993_v43, %v712_v53 }
 0x398   :  { %v715_v38 = vsub.f32 1.0, %v2995_v39  ;;  %v713_v34 = vmul.f32 %v2995_v39, %v712_v53 }
 0x427   :  { %v2788_v41 = vpop.f32.mrf.mxu1 }
 0x428   :  { %v706_v60 = vadd.f32 %v2788_v41, %v370_v40 }
 0x429   :  { %v696_v4 = vpop.f32.mrf.mxu1 }
 0x42a   :  { %2996 = vtanh.f32 %v706_v60  ;;  %v705_v51 = vadd.f32 %v696_v4, %v365_v25  ;;  %v3556_v39 = vpop.f32.mrf.mxu0 }
 0x42b   :  { %3873 = vst [vmem:[#allocation26_spill] sm:$0xff] %v3556_v39  ;;  %v882_v41 = vpop.f32.mrf.mxu1 }
 0x42c   :  { %2998 = vtanh.f32 %v705_v51  ;;  %v883_v51 = vadd.f32 %v882_v41, %v3391_v55 }
 0x42d   :  { %v884_v25 = vpop.f32.mrf.mxu1 }
 0x42e   :  { %v885_v53 = vadd.f32 %v884_v25, %v3394_v56 }
 0x42f   :  { %v888_v60 = vpop.f32.mrf.mxu1 }
 0x431   :  { %v890_v4 = vpop.f32.mrf.mxu1 }
 0x437   :  { %v2997_v57 = vpop.eup %2996 }
 0x438   :  { %v718_v46 = vmul.f32 %v2997_v57, %v716_v54  ;;  %v889_v57 = vadd.f32 %v888_v60, %v3391_v55 }
 0x439   :  { %v2999_v35 = vpop.eup %2998 }
 0x43a   :  { %v720_v33 = vadd.f32 %v718_v46, %v714_v58  ;;  %v717_v47 = vmul.f32 %v2999_v35, %v715_v38  ;;  %v3558_v35 = vpop.f32.mrf.mxu0  ;;  %v891_v38 = vadd.f32 %v890_v4, %v3394_v56 }
 0x43b   :  { %3874 = vst [vmem:[#allocation27_spill] sm:$0xff] %v3558_v35 }
 0x43c   :  { %722 = vst [vmem:[#allocation8 + $0x8] sm:$0xff] %v720_v33  ;;  %2801 = vmatprep.subr.mxu0 %v720_v33  ;;  %v3547_v36 = vadd.f32 %v717_v47, %v713_v34 }
 0x43d   :  { %2802 = vmatpush3.msra.mxu0 %v720_v33 }
 0x43e   :  { %2803 = vmatprep.subr.mxu0 %v3547_v36  ;;  %721 = vst [vmem:[#allocation8] sm:$0xff] %v3547_v36 }
 0x43f   :  { %2804 = vmatpush3.msra.mxu0 %v3547_v36 }
 0x440   :  { %2806 = vmatmul.mubr.msk.f32.vlgmr.msra.gmra.mxu0 %vm116_vm0, %v3487_v6 }
 0x441   :  { %2812 = vmatprep.mubr.msk.f32.mxu0 %vm116_vm0, %v3479_v59 }
 0x500   :  { %v2807_v40 = vpop.f32.mrf.mxu0 }
 0x502   :  { %v1034_v34 = vpop.f32.mrf.mxu0 }
 0x503   :  { %1108 = vmatmul.mubr.f32.vlgmr.msra.gmra.mxu1 %v1034_v34 }
 0x504   :  { %1113 = vmatprep.mubr.f32.mxu1 %v3872_v44 }
 0x507   :  { %1114 = vmatmul.mubr.f32.gmra.mxu1 %v2807_v40 }
 0x5c3   :  { %v1109_v43 = vpop.f32.mrf.mxu1 }
 0x5c4   :  { %v3563_v59 = vadd.f32 %v1109_v43, %v883_v51 }
 0x5c5   :  { %v1111_v54 = vpop.f32.mrf.mxu1 }
 0x5c6   :  { %v1134_v58 = vadd.f32 %v1111_v54, %v885_v53  ;;  %v3614_v54 = vld [vmem:[%s3825_s0 + $0x20] sm:$0xff] }
 0x5c7   :  { %v1115_v46 = vpop.f32.mrf.mxu1  ;;  %2854 = vmatprep.mubr.msk.f32.mxu1 %vm116_vm0, %v3614_v54 }
 0x5c8   :  { %v2559_v47 = vmul.f32 -1.442695, %v1134_v58  ;;  %v3567_v40 = vadd.f32 %v1115_v46, %v889_v57  ;;  %v3621_v57 = vld [vmem:[%s3825_s0 + $0x28] sm:$0xff]  ;;  %v3878_v58 = vld [vmem:[#allocation12_spill] sm:$0xff] }
 0x5c9   :  { %v1117_v34 = vpop.f32.mrf.mxu1 }
 0x5ca   :  { %3000 = vpow2.f32 %v2559_v47  ;;  %v1135_v52 = vadd.f32 %v1117_v34, %v891_v38 }
 0x5cc   :  { %v2560_v35 = vmul.f32 -1.442695, %v1135_v52  ;;  %v3877_v52 = vld [vmem:[#allocation25_spill] sm:$0xff] }
 0x5ce   :  { %3002 = vpow2.f32 %v2560_v35  ;;  %v2565_v35 = vld [vmem:[%s3826_s1 + $0x20] sm:$0xff] }
 0x5d7   :  { %v3001_v41 = vpop.eup %3000 }
 0x5d8   :  { %v1142_v39 = vadd.f32 1.0, %v3001_v41 }
 0x5da   :  { %3004 = vrcp.f32 %v1142_v39  ;;  %v2566_v39 = vld [vmem:[%s3826_s1 + $0x28] sm:$0xff] }
 0x5db   :  { %v3003_v25 = vpop.eup %3002  ;;  %2850 = vmatprep.subr.mxu1 %v2566_v39 }
 0x5dc   :  { %v1143_v51 = vadd.f32 1.0, %v3003_v25  ;;  %2851 = vmatpush3.msra.mxu1 %v2566_v39 }
 0x5dd   :  { %2852 = vmatprep.subr.mxu1 %v2565_v35 }
 0x5de   :  { %3006 = vrcp.f32 %v1143_v51  ;;  %2853 = vmatpush3.msra.mxu1 %v2565_v35 }
 0x5df   :  { %2855 = vmatmul.mubr.msk.f32.vlgmr.msra.gmra.mxu1 %vm116_vm0, %v3621_v57  ;;  %1442 = vmatprep.subr.mxu1 %v3878_v58 }
 0x5e0   :  { %1443 = vmatpush1.msra.mxu1 %v3252_v5  ;;  %1476 = vmatprep.mubr.f32.mxu1 %v3872_v44  ;;  %v3879_v5 = vld [vmem:[#allocation13_spill] sm:$0xff] }
 0x5e1   :  { %1639 = vmatprep.subr.mxu1 %v3263_v8  ;;  %v3881_v8 = vld [vmem:[#allocation15_spill] sm:$0xff] }
 0x5e7   :  { %v3005_v43 = vpop.eup %3004 }
 0x5e8   :  { %v1148_v4 = vmul.f32 %v3005_v43, %v3547_v36 }
 0x5eb   :  { %v3007_v60 = vpop.eup %3006 }
 0x5ec   :  { %v1149_v53 = vmul.f32 %v3007_v60, %v720_v33  ;;  %v3876_v33 = vld [vmem:[#allocation24_spill] sm:$0xff] }
 0x5ee   :  { %2808 = vmatprep.subr.mxu0 %v1149_v53 }
 0x5ef   :  { %2809 = vmatpush3.msra.mxu0 %v1149_v53 }
 0x5f0   :  { %2810 = vmatprep.subr.mxu0 %v1148_v4 }
 0x5f1   :  { %2811 = vmatpush3.msra.mxu0 %v1148_v4 }
 0x5f2   :  { %2813 = vmatmul.mubr.msk.f32.vlgmr.msra.gmra.mxu0 %vm116_vm0, %v3487_v6  ;;  %2815 = vmatprep.subr.mxu0 %v3404_v45  ;;  %v3875_v6 = vld [vmem:[#allocation23_spill] sm:$0xff] }
 0x5f3   :  { %2816 = vmatpush3.msra.mxu0 %v3404_v45 }
 0x5f4   :  { %2817 = vmatprep.subr.mxu0 %v3406_v61 }
 0x5f5   :  { %2818 = vmatpush3.msra.mxu0 %v3406_v61 }
 0x5f6   :  { %2819 = vmatprep.subr.mxu0 %v3412_v62 }
 0x5f7   :  { %2820 = vmatpush3.msra.mxu0 %v3412_v62 }
 0x5f8   :  { %2821 = vmatprep.subr.mxu0 %v3416_v63 }
 0x5f9   :  { %2822 = vmatpush3.msra.mxu0 %v3416_v63 }
 0x5fa   :  { %2823 = vmatprep.subr.mxu0 %v3420_v0 }
 0x5fb   :  { %2824 = vmatpush3.msra.mxu0 %v3420_v0 }
 0x5fc   :  { %2825 = vmatprep.subr.mxu0 %v3424_v3 }
 0x5fd   :  { %2826 = vmatpush3.msra.mxu0 %v3424_v3 }
 0x5fe   :  { %2827 = vmatprep.subr.mxu0 %v3428_v1 }
 0x5ff   :  { %2828 = vmatpush3.msra.mxu0 %v3428_v1 }
 0x600   :  { %2829 = vmatprep.subr.mxu0 %v3432_v2 }
 0x601   :  { %2830 = vmatpush3.msra.mxu0 %v3432_v2 }
 0x602   :  { %2831 = vmatprep.subr.mxu0 %v3436_v26 }
 0x603   :  { %2832 = vmatpush3.msra.mxu0 %v3436_v26 }
 0x604   :  { %2833 = vmatprep.subr.mxu0 %v3440_v48 }
 0x605   :  { %2834 = vmatpush3.msra.mxu0 %v3440_v48 }
 0x606   :  { %2835 = vmatprep.subr.mxu0 %v3444_v49 }
 0x607   :  { %2836 = vmatpush3.msra.mxu0 %v3444_v49 }
 0x608   :  { %2837 = vmatprep.subr.mxu0 %v3448_v42 }
 0x609   :  { %2838 = vmatpush3.msra.mxu0 %v3448_v42 }
 0x60a   :  { %2839 = vmatprep.subr.mxu0 %v3452_v50 }
 0x60b   :  { %2840 = vmatpush3.msra.mxu0 %v3452_v50 }
 0x60c   :  { %2841 = vmatprep.subr.mxu0 %v3875_v6 }
 0x60d   :  { %2842 = vmatpush3.msra.mxu0 %v3875_v6 }
 0x60e   :  { %2843 = vmatprep.subr.mxu0 %v3876_v33 }
 0x60f   :  { %2844 = vmatpush3.msra.mxu0 %v3876_v33 }
 0x610   :  { %2845 = vmatprep.subr.mxu0 %v3877_v52 }
 0x611   :  { %2846 = vmatpush3.msra.mxu0 %v3877_v52 }
 0x612   :  { %2857 = vmatprep.subr.mxu0 %v3259_v7 }
 0x69f   :  { %v2856_v47 = vpop.f32.mrf.mxu1 }
 0x6a1   :  { %v1397_v34 = vpop.f32.mrf.mxu1 }
 0x6a2   :  { %2569 = vmatmul.mubr.msk.f32.vlgmr.msra.gmra.mxu1 %vm214_vm1, %v1397_v34 }
 0x6a3   :  { %1482 = vmatprep.mubr.f32.mxu1 %v3872_v44  ;;  %1640 = vmatpush1.msra.mxu1 %v3265_v9  ;;  %v3882_v9 = vld [vmem:[#allocation16_spill] sm:$0xff] }
 0x6a4   :  { %1641 = vmatprep.subr.mxu1 %v3267_v10  ;;  %v3883_v10 = vld [vmem:[#allocation17_spill] sm:$0xff] }
 0x6a5   :  { %1642 = vmatpush1.msra.mxu1 %v3270_v11  ;;  %v3884_v11 = vld [vmem:[#allocation18_spill] sm:$0xff] }
 0x6a6   :  { %2570 = vmatmul.mubr.msk.f32.gmra.mxu1 %vm214_vm1, %v2856_v47  ;;  %1643 = vmatprep.subr.mxu1 %v3273_v12  ;;  %v3885_v12 = vld [vmem:[#allocation19_spill] sm:$0xff] }
 0x6a7   :  { %1703 = vmatprep.mubr.f32.mxu1 %v3872_v44  ;;  %1644 = vmatpush1.msra.mxu1 %v3276_v13  ;;  %v3886_v13 = vld [vmem:[#allocation20_spill] sm:$0xff] }
 0x6a8   :  { %1645 = vmatprep.subr.mxu1 %v3279_v14  ;;  %v3887_v14 = vld [vmem:[#allocation21_spill] sm:$0xff] }
 0x6a9   :  { %1646 = vmatpush1.msra.mxu1 %v3282_v15  ;;  %v2558_v15 = vmul.f32 -1.442695, %v3567_v40 }
 0x6aa   :  { %1647 = vmatprep.subr.mxu1 %v3285_v16  ;;  %v2557_v16 = vmul.f32 -1.442695, %v3563_v59  ;;  %v3890_v59 = vld [vmem:[#allocation22_spill] sm:$0xff] }
 0x6ab   :  { %1648 = vmatpush1.msra.mxu1 %v3288_v17  ;;  %3008 = vpow2.f32 %v2558_v15  ;;  %v1307_v40 = vrot.slane %v3547_v36, %v3890_v59 }
 0x6ac   :  { %1649 = vmatprep.subr.mxu1 %v3291_v18  ;;  %3010 = vpow2.f32 %v2557_v16 }
 0x6ad   :  { %1650 = vmatpush1.msra.mxu1 %v3294_v19 }
 0x6ae   :  { %1651 = vmatprep.subr.mxu1 %v3297_v20 }
 0x6af   :  { %1652 = vmatpush1.msra.mxu1 %v3300_v21  ;;  %v3888_v21 = vld [vmem:[#allocation26_spill] sm:$0xff] }
 0x6b0   :  { %1653 = vmatprep.subr.mxu1 %v3303_v22  ;;  %v965_v22 = vadd.f32 %v3888_v21, %v3539_v37 }
 0x6b1   :  { %1654 = vmatpush1.msra.mxu1 %v3306_v23 }
 0x6b2   :  { %v2814_v46 = vpop.f32.mrf.mxu0  ;;  %1655 = vmatprep.subr.mxu1 %v3309_v24  ;;  %v3889_v24 = vld [vmem:[#allocation27_spill] sm:$0xff] }
 0x6b3   :  { %1656 = vmatpush1.msra.mxu1 %v3328_v27  ;;  %v960_v27 = vadd.f32 %v3889_v24, %v3539_v37 }
 0x6b4   :  { %v1216_v38 = vpop.f32.mrf.mxu0  ;;  %1657 = vmatprep.subr.mxu1 %v3331_v28 }
 0x6b5   :  { %2847 = vmatprep.mubr.f32.mxu0 %v1216_v38  ;;  %1658 = vmatpush1.msra.mxu1 %v3334_v29 }
 0x6b6   :  { %2848 = vmatmul.mubr.f32.vlgmr.msra.gmra.mxu0 %v2814_v46  ;;  %1659 = vmatprep.subr.mxu1 %v3337_v30 }
 0x6b7   :  { %2858 = vmatpush3.msra.mxu0 %v3259_v7  ;;  %2859 = vmatprep.mubr.msk.f32.mxu0 %vm214_vm1, %v1397_v34  ;;  %v3880_v7 = vld [vmem:[#allocation14_spill] sm:$0xff] }
 0x6b8   :  { %1660 = vmatpush1.msra.mxu1 %v3340_v31  ;;  %v3009_v17 = vpop.eup %3008 }
 0x6b9   :  { %1661 = vmatprep.subr.mxu1 %v3343_v32  ;;  %v3011_v18 = vpop.eup %3010  ;;  %v1129_v19 = vadd.f32 1.0, %v3009_v17 }
 0x6ba   :  { %2860 = vmatmul.mubr.msk.f32.vlgmr.msra.gmra.mxu0 %vm214_vm1, %v2856_v47  ;;  %1662 = vmatpush1.msra.mxu1 %v3879_v5  ;;  %v1128_v20 = vadd.f32 1.0, %v3011_v18 }
 0x6bb   :  { %2866 = vmatprep.mubr.msk.f32.mxu0 %vm116_vm0, %v3614_v54  ;;  %1663 = vmatprep.subr.mxu1 %v3880_v7  ;;  %3012 = vrcp.f32 %v1129_v19 }
 0x6bc   :  { %1664 = vmatpush1.msra.mxu1 %v3881_v8  ;;  %3014 = vrcp.f32 %v1128_v20 }
 0x6bd   :  { %1665 = vmatprep.subr.mxu1 %v3882_v9 }
 0x6be   :  { %1666 = vmatpush1.msra.mxu1 %v3883_v10 }
 0x6bf   :  { %1667 = vmatprep.subr.mxu1 %v3884_v11 }
 0x6c0   :  { %1668 = vmatpush1.msra.mxu1 %v3885_v12 }
 0x6c1   :  { %1669 = vmatprep.subr.mxu1 %v3886_v13 }
 0x6c2   :  { %1670 = vmatpush1.msra.mxu1 %v3887_v14 }
 0x6c8   :  { %v3013_v31 = vpop.eup %3012 }
 0x6c9   :  { %v3015_v32 = vpop.eup %3014  ;;  %v1311_v41 = vsub.f32 1.0, %v3013_v31  ;;  %v1309_v51 = vmul.f32 %v3013_v31, %v1307_v40 }
 0x6ca   :  { %v1310_v60 = vsub.f32 1.0, %v3015_v32  ;;  %v1308_v4 = vmul.f32 %v3015_v32, %v1307_v40 }
 0x762   :  { %v1478_v34 = vpop.f32.mrf.mxu1 }
 0x763   :  { %v1479_v15 = vadd.f32 %v1478_v34, %v3391_v55  ;;  %v3076_v34 = vld [vmem:[#allocation3 + $0x90] sm:$0xff] }
 0x764   :  { %v1480_v5 = vpop.f32.mrf.mxu1 }
 0x765   :  { %v1481_v17 = vadd.f32 %v1480_v5, %v3394_v56  ;;  %v3077_v5 = vld [vmem:[#allocation3 + $0x88] sm:$0xff] }
 0x766   :  { %v1484_v7 = vpop.f32.mrf.mxu1 }
 0x767   :  { %v1485_v19 = vadd.f32 %v1484_v7, %v3391_v55  ;;  %v3078_v7 = vld [vmem:[#allocation3 + $0x80] sm:$0xff] }
 0x768   :  { %v1486_v8 = vpop.f32.mrf.mxu1 }
 0x776   :  { %v2849_v23 = vpop.f32.mrf.mxu0 }
 0x777   :  { %v1301_v28 = vadd.f32 %v2849_v23, %v965_v22  ;;  %v1487_v22 = vadd.f32 %v1486_v8, %v3394_v56  ;;  %v3079_v8 = vld [vmem:[#allocation3 + $0x78] sm:$0xff] }
 0x778   :  { %v1291_v29 = vpop.f32.mrf.mxu0 }
 0x779   :  { %3016 = vtanh.f32 %v1301_v28  ;;  %v1300_v30 = vadd.f32 %v1291_v29, %v960_v27 }
 0x77a   :  { %v3686_v36 = vpop.f32.mrf.mxu0 }
 0x77b   :  { %3018 = vtanh.f32 %v1300_v30 }
 0x77c   :  { %v3688_v46 = vpop.f32.mrf.mxu0 }
 0x786   :  { %v3017_v25 = vpop.eup %3016 }
 0x787   :  { %v1313_v43 = vmul.f32 %v3017_v25, %v1311_v41 }
 0x788   :  { %v3019_v53 = vpop.eup %3018 }
 0x789   :  { %v1315_v39 = vadd.f32 %v1313_v43, %v1309_v51  ;;  %v1312_v35 = vmul.f32 %v3019_v53, %v1310_v60  ;;  %v3069_v60 = vld [vmem:[#allocation3 + $0xc8] sm:$0xff]  ;;  %v3070_v53 = vld [vmem:[#allocation3 + $0xc0] sm:$0xff] }
 0x78b   :  { %1318 = vst [vmem:[#allocation8 + $0x18] sm:$0xff] %v1315_v39  ;;  %2862 = vmatprep.subr.mxu0 %v1315_v39  ;;  %v3677_v58 = vadd.f32 %v1312_v35, %v1308_v4  ;;  %v3071_v4 = vld [vmem:[#allocation3 + $0xb8] sm:$0xff]  ;;  %v3073_v35 = vld [vmem:[#allocation3 + $0xa8] sm:$0xff] }
 0x78c   :  { %2863 = vmatpush3.msra.mxu0 %v1315_v39 }
 0x78d   :  { %2864 = vmatprep.subr.mxu0 %v3677_v58  ;;  %1317 = vst [vmem:[#allocation8 + $0x10] sm:$0xff] %v3677_v58 }
 0x78e   :  { %2865 = vmatpush3.msra.mxu0 %v3677_v58 }
 0x78f   :  { %2867 = vmatmul.mubr.msk.f32.vlgmr.msra.gmra.mxu0 %vm116_vm0, %v3621_v57 }
 0x790   :  { %2873 = vmatprep.mubr.msk.f32.mxu0 %vm116_vm0, %v3614_v54 }
 0x84f   :  { %v2868_v38 = vpop.f32.mrf.mxu0 }
 0x851   :  { %v1630_v47 = vpop.f32.mrf.mxu0 }
 0x852   :  { %1704 = vmatmul.mubr.f32.vlgmr.msra.gmra.mxu1 %v1630_v47  ;;  %v3075_v47 = vld [vmem:[#allocation3 + $0x98] sm:$0xff] }
 0x853   :  { %1709 = vmatprep.mubr.f32.mxu1 %v3872_v44 }
 0x856   :  { %1710 = vmatmul.mubr.f32.gmra.mxu1 %v2868_v38  ;;  %v3074_v38 = vld [vmem:[#allocation3 + $0xa0] sm:$0xff] }
 0x912   :  { %v1705_v16 = vpop.f32.mrf.mxu1 }
 0x913   :  { %v3693_v54 = vadd.f32 %v1705_v16, %v1479_v15  ;;  %v3080_v15 = vld [vmem:[#allocation3 + $0x70] sm:$0xff]  ;;  %v3081_v16 = vld [vmem:[#allocation3 + $0x68] sm:$0xff] }
 0x914   :  { %v1707_v18 = vpop.f32.mrf.mxu1 }
 0x915   :  { %v1730_v20 = vadd.f32 %v1707_v18, %v1481_v17  ;;  %v3082_v17 = vld [vmem:[#allocation3 + $0x60] sm:$0xff]  ;;  %v3083_v18 = vld [vmem:[#allocation3 + $0x58] sm:$0xff] }
 0x916   :  { %v1711_v21 = vpop.f32.mrf.mxu1 }
 0x917   :  { %v2577_v23 = vmul.f32 -1.442695, %v1730_v20  ;;  %v3697_v24 = vadd.f32 %v1711_v21, %v1485_v19  ;;  %v3084_v19 = vld [vmem:[#allocation3 + $0x50] sm:$0xff]  ;;  %v3085_v20 = vld [vmem:[#allocation3 + $0x48] sm:$0xff]  ;;  %v3086_v21 = vld [vmem:[#allocation3 + $0x40] sm:$0xff] }
 0x918   :  { %v1713_v27 = vpop.f32.mrf.mxu1 }
 0x919   :  { %3020 = vpow2.f32 %v2577_v23  ;;  %v1731_v28 = vadd.f32 %v1713_v27, %v1487_v22  ;;  %v3087_v22 = vld [vmem:[#allocation3 + $0x38] sm:$0xff]  ;;  %v3088_v23 = vld [vmem:[#allocation3 + $0x30] sm:$0xff]  ;;  %v2576_v27 = vmul.f32 -1.442695, %v3697_v24 }
 0x91b   :  { %v2578_v29 = vmul.f32 -1.442695, %v1731_v28  ;;  %v2575_v28 = vmul.f32 -1.442695, %v3693_v54 }
 0x91d   :  { %3022 = vpow2.f32 %v2578_v29 }
 0x926   :  { %v3021_v30 = vpop.eup %3020 }
 0x927   :  { %v1738_v31 = vadd.f32 1.0, %v3021_v30 }
 0x929   :  { %3024 = vrcp.f32 %v1738_v31 }
 0x92a   :  { %v3023_v32 = vpop.eup %3022 }
 0x92b   :  { %v1739_v40 = vadd.f32 1.0, %v3023_v32 }
 0x92d   :  { %3026 = vrcp.f32 %v1739_v40  ;;  %v1903_v40 = vrot.slane %v3677_v58, %v3890_v59 }
 0x92e   :  { %3028 = vpow2.f32 %v2576_v27  ;;  %v3095_v27 = vld [vmem:[#allocation6 + $0x48] sm:$0xff] }
 0x92f   :  { %3030 = vpow2.f32 %v2575_v28  ;;  %v3097_v28 = vld [vmem:[#allocation6 + $0x38] sm:$0xff] }
 0x936   :  { %v3025_v41 = vpop.eup %3024 }
 0x937   :  { %v1744_v43 = vmul.f32 %v3025_v41, %v3677_v58 }
 0x93a   :  { %v3027_v25 = vpop.eup %3026 }
 0x93b   :  { %v1745_v51 = vmul.f32 %v3027_v25, %v1315_v39  ;;  %v3072_v39 = vld [vmem:[#allocation3 + $0xb0] sm:$0xff]  ;;  %v3029_v29 = vpop.eup %3028 }
 0x93c   :  { %v3031_v30 = vpop.eup %3030  ;;  %v1725_v31 = vadd.f32 1.0, %v3029_v29  ;;  %v3098_v29 = vld [vmem:[#allocation6 + $0x30] sm:$0xff] }
 0x93d   :  { %2869 = vmatprep.subr.mxu0 %v1745_v51 }
 0x93e   :  { %2870 = vmatpush3.msra.mxu0 %v1745_v51  ;;  %3032 = vrcp.f32 %v1725_v31  ;;  %v3100_v31 = vld [vmem:[#allocation6 + $0x20] sm:$0xff] }
 0x93f   :  { %2871 = vmatprep.subr.mxu0 %v1744_v43 }
 0x940   :  { %2872 = vmatpush3.msra.mxu0 %v1744_v43 }
 0x941   :  { %2874 = vmatmul.mubr.msk.f32.vlgmr.msra.gmra.mxu0 %vm116_vm0, %v3621_v57  ;;  %2876 = vmatprep.subr.mxu0 %v3404_v45  ;;  %v3068_v57 = vld [vmem:[#allocation3 + $0xd0] sm:$0xff] }
 0x942   :  { %2877 = vmatpush3.msra.mxu0 %v3404_v45  ;;  %v3060_v45 = vld [vmem:[%s3827_s2 + $0x10] sm:$0xff] }
 0x943   :  { %2878 = vmatprep.subr.mxu0 %v3406_v61 }
 0x944   :  { %2879 = vmatpush3.msra.mxu0 %v3406_v61  ;;  %v2584_v61 = vld [vmem:[%s3826_s1 + $0x38] sm:$0xff] }
 0x945   :  { %2880 = vmatprep.subr.mxu0 %v3412_v62  ;;  %2911 = vmatprep.subr.mxu1 %v2584_v61 }
 0x946   :  { %2881 = vmatpush3.msra.mxu0 %v3412_v62  ;;  %v2583_v62 = vld [vmem:[%s3826_s1 + $0x30] sm:$0xff]  ;;  %2912 = vmatpush3.msra.mxu1 %v2584_v61 }
 0x947   :  { %2882 = vmatprep.subr.mxu0 %v3416_v63  ;;  %2913 = vmatprep.subr.mxu1 %v2583_v62 }
 0x948   :  { %2883 = vmatpush3.msra.mxu0 %v3416_v63  ;;  %v3746_v63 = vld [vmem:[%s3825_s0 + $0x30] sm:$0xff]  ;;  %2914 = vmatpush3.msra.mxu1 %v2583_v62 }
 0x949   :  { %2884 = vmatprep.subr.mxu0 %v3420_v0  ;;  %2915 = vmatprep.mubr.msk.f32.mxu1 %vm116_vm0, %v3746_v63 }
 0x94a   :  { %2885 = vmatpush3.msra.mxu0 %v3420_v0  ;;  %v3753_v0 = vld [vmem:[%s3825_s0 + $0x38] sm:$0xff]  ;;  %s3178_s0 = smov [#allocation8]  }
 0x94b   :  { %2886 = vmatprep.subr.mxu0 %v3424_v3  ;;  %2916 = vmatmul.mubr.msk.f32.vlgmr.msra.gmra.mxu1 %vm116_vm0, %v3753_v0  ;;  %v3033_v54 = vpop.eup %3032 }
 0x94c   :  { %2887 = vmatpush3.msra.mxu0 %v3424_v3  ;;  %v3061_v3 = vld [vmem:[%s3827_s2 + $0x8] sm:$0xff]  ;;  %2072 = vmatprep.mubr.f32.mxu1 %v3872_v44  ;;  %v1907_v41 = vsub.f32 1.0, %v3033_v54  ;;  %v1905_v51 = vmul.f32 %v3033_v54, %v1903_v40 }
 0x94d   :  { %2888 = vmatprep.subr.mxu0 %v3428_v1  ;;  %2038 = vmatprep.subr.mxu1 %v3061_v3 }
 0x94e   :  { %2889 = vmatpush3.msra.mxu0 %v3428_v1  ;;  %v3062_v1 = vld [vmem:[%s3827_s2] sm:$0xff]  ;;  %s2518_s2 = sshll.u32 %s3178_s0, 4  ;;  %s2519_s2 = int_to_ptr.vmem [resolvable:$true] %s2518_s2 }
 0x94f   :  { %2890 = vmatprep.subr.mxu0 %v3432_v2  ;;  %2039 = vmatpush1.msra.mxu1 %v3062_v1  ;;  %s3145_s28 = scalar_lea.vmem %s2519_s2, 1024  ;;  %p3150_p11 = scmp.lt.s32.totalorder %s2519_s2, %s2519_s2 }
 0x950   :  { %2891 = vmatpush3.msra.mxu0 %v3432_v2  ;;  %v3063_v2 = vld [vmem:[#allocation3 + $0xf8] sm:$0xff]  ;;  %p3146_p10 = scmp.ne.s32.totalorder %s2519_s2, %s3145_s28  ;;  %p3151_p12 = scmp.lt.s32.totalorder %s3145_s28, %s3145_s28 }
 0x951   :  { %2892 = vmatprep.subr.mxu0 %v3436_v26  ;;  %2235 = vmatprep.subr.mxu1 %v3063_v2 }
 0x952   :  { %2893 = vmatpush3.msra.mxu0 %v3436_v26  ;;  %p3152_p13 = por %p3151_p12, %p3150_p11 }
 0x953   :  { %2894 = vmatprep.subr.mxu0 %v3440_v48 }
 0x954   :  { %2895 = vmatpush3.msra.mxu0 %v3440_v48  ;;  %p3153_p0 = pnand %p3152_p13, %p3146_p10 }
 0x955   :  { %2896 = vmatprep.subr.mxu0 %v3444_v49 }
 0x956   :  { %2897 = vmatpush3.msra.mxu0 %v3444_v49 }
 0x957   :  { %2898 = vmatprep.subr.mxu0 %v3448_v42 }
 0x958   :  { %2899 = vmatpush3.msra.mxu0 %v3448_v42 }
 0x959   :  { %2900 = vmatprep.subr.mxu0 %v3452_v50 }
 0x95a   :  { %2901 = vmatpush3.msra.mxu0 %v3452_v50  ;;  %v3064_v50 = vld [vmem:[#allocation3 + $0xf0] sm:$0xff] }
 0x95b   :  { %2902 = vmatprep.subr.mxu0 %v3875_v6 }
 0x95c   :  { %2903 = vmatpush3.msra.mxu0 %v3875_v6  ;;  %v3065_v6 = vld [vmem:[#allocation3 + $0xe8] sm:$0xff] }
 0x95d   :  { %2904 = vmatprep.subr.mxu0 %v3876_v33 }
 0x95e   :  { %2905 = vmatpush3.msra.mxu0 %v3876_v33  ;;  %v3066_v33 = vld [vmem:[#allocation3 + $0xe0] sm:$0xff] }
 0x95f   :  { %2906 = vmatprep.subr.mxu0 %v3877_v52 }
 0x960   :  { %2907 = vmatpush3.msra.mxu0 %v3877_v52  ;;  %v3067_v52 = vld [vmem:[#allocation3 + $0xd8] sm:$0xff] }
 0x961   :  { %2918 = vmatprep.subr.mxu0 %v3060_v45 }
 0xa01   :  { %v2875_v26 = vpop.f32.mrf.mxu0 }
 0xa03   :  { %v1812_v48 = vpop.f32.mrf.mxu0 }
 0xa04   :  { %2908 = vmatprep.mubr.f32.mxu0 %v1812_v48 }
 0xa05   :  { %2909 = vmatmul.mubr.f32.vlgmr.msra.gmra.mxu0 %v2875_v26 }
 0xa06   :  { %2919 = vmatpush3.msra.mxu0 %v3060_v45 }
 0xa0b   :  { %v2917_v49 = vpop.f32.mrf.mxu1 }
 0xa0d   :  { %v1993_v42 = vpop.f32.mrf.mxu1 }
 0xa0e   :  { %2587 = vmatmul.mubr.msk.f32.vlgmr.msra.gmra.mxu1 %vm214_vm1, %v1993_v42  ;;  %2920 = vmatprep.mubr.msk.f32.mxu0 %vm214_vm1, %v1993_v42 }
 0xa0f   :  { %2078 = vmatprep.mubr.f32.mxu1 %v3872_v44  ;;  %2921 = vmatmul.mubr.msk.f32.vlgmr.msra.gmra.mxu0 %vm214_vm1, %v2917_v49 }
 0xa10   :  { %2927 = vmatprep.mubr.msk.f32.mxu0 %vm116_vm0, %v3746_v63  ;;  %2236 = vmatpush1.msra.mxu1 %v3064_v50 }
 0xa11   :  { %2237 = vmatprep.subr.mxu1 %v3065_v6 }
 0xa12   :  { %2588 = vmatmul.mubr.msk.f32.gmra.mxu1 %vm214_vm1, %v2917_v49 }
 0xa13   :  { %2238 = vmatpush1.msra.mxu1 %v3066_v33  ;;  %2299 = vmatprep.mubr.f32.mxu1 %v3872_v44 }
 0xa14   :  { %2239 = vmatprep.subr.mxu1 %v3067_v52 }
 0xa15   :  { %2240 = vmatpush1.msra.mxu1 %v3068_v57 }
 0xa16   :  { %2241 = vmatprep.subr.mxu1 %v3069_v60 }
 0xa17   :  { %2242 = vmatpush1.msra.mxu1 %v3070_v53 }
 0xa18   :  { %2243 = vmatprep.subr.mxu1 %v3071_v4 }
 0xa19   :  { %2244 = vmatpush1.msra.mxu1 %v3072_v39 }
 0xa1a   :  { %2245 = vmatprep.subr.mxu1 %v3073_v35 }
 0xa1b   :  { %2246 = vmatpush1.msra.mxu1 %v3074_v38 }
 0xa1c   :  { %2247 = vmatprep.subr.mxu1 %v3075_v47 }
 0xa1d   :  { %2248 = vmatpush1.msra.mxu1 %v3076_v34 }
 0xa1e   :  { %2249 = vmatprep.subr.mxu1 %v3077_v5 }
 0xa1f   :  { %2250 = vmatpush1.msra.mxu1 %v3078_v7 }
 0xa20   :  { %2251 = vmatprep.subr.mxu1 %v3079_v8 }
 0xa21   :  { %2252 = vmatpush1.msra.mxu1 %v3080_v15 }
 0xa22   :  { %2253 = vmatprep.subr.mxu1 %v3081_v16 }
 0xa23   :  { %2254 = vmatpush1.msra.mxu1 %v3082_v17 }
 0xa24   :  { %2255 = vmatprep.subr.mxu1 %v3083_v18  ;;  %v3089_v18 = vld [vmem:[#allocation6 + $0x78] sm:$0xff] }
 0xa25   :  { %2256 = vmatpush1.msra.mxu1 %v3084_v19  ;;  %v3090_v19 = vld [vmem:[#allocation6 + $0x70] sm:$0xff] }
 0xa26   :  { %2257 = vmatprep.subr.mxu1 %v3085_v20  ;;  %v3091_v20 = vld [vmem:[#allocation6 + $0x68] sm:$0xff] }
 0xa27   :  { %2258 = vmatpush1.msra.mxu1 %v3086_v21  ;;  %v3092_v21 = vld [vmem:[#allocation6 + $0x60] sm:$0xff] }
 0xa28   :  { %2259 = vmatprep.subr.mxu1 %v3087_v22  ;;  %v3093_v22 = vld [vmem:[#allocation6 + $0x58] sm:$0xff] }
 0xa29   :  { %2260 = vmatpush1.msra.mxu1 %v3088_v23  ;;  %v3094_v23 = vld [vmem:[#allocation6 + $0x50] sm:$0xff] }
 0xa2a   :  { %2261 = vmatprep.subr.mxu1 %v3882_v9  ;;  %v1724_v9 = vadd.f32 1.0, %v3031_v30  ;;  %v3099_v30 = vld [vmem:[#allocation6 + $0x28] sm:$0xff] }
 0xa2b   :  { %2262 = vmatpush1.msra.mxu1 %v3883_v10  ;;  %v1561_v10 = vadd.f32 %v3686_v36, %v3539_v37 }
 0xa2c   :  { %2263 = vmatprep.subr.mxu1 %v3884_v11  ;;  %3034 = vrcp.f32 %v1724_v9  ;;  %v3101_v9 = vld [vmem:[#allocation6 + $0x18] sm:$0xff] }
 0xa2d   :  { %2264 = vmatpush1.msra.mxu1 %v3885_v12  ;;  %v1556_v12 = vadd.f32 %v3688_v46, %v3539_v37 }
 0xa2e   :  { %2265 = vmatprep.subr.mxu1 %v3886_v13 }
 0xa2f   :  { %2266 = vmatpush1.msra.mxu1 %v3887_v14 }
 0xa39   :  { %v3035_v32 = vpop.eup %3034 }
 0xa3a   :  { %v1906_v43 = vsub.f32 1.0, %v3035_v32  ;;  %v1904_v61 = vmul.f32 %v3035_v32, %v1903_v40 }
 0xac5   :  { %v2910_v11 = vpop.f32.mrf.mxu0 }
 0xac6   :  { %v1897_v13 = vadd.f32 %v2910_v11, %v1561_v10  ;;  %v3102_v10 = vld [vmem:[#allocation6 + $0x10] sm:$0xff]  ;;  %v3103_v11 = vld [vmem:[#allocation6 + $0x8] sm:$0xff] }
 0xac7   :  { %v1887_v14 = vpop.f32.mrf.mxu0 }
 0xac8   :  { %3036 = vtanh.f32 %v1897_v13  ;;  %v1896_v24 = vadd.f32 %v1887_v14, %v1556_v12  ;;  %v3104_v12 = vld [vmem:[#allocation6] sm:$0xff] }
 0xaca   :  { %3038 = vtanh.f32 %v1896_v24 }
 0xace   :  { %v2074_v48 = vpop.f32.mrf.mxu1 }
 0xacf   :  { %v3795_v58 = vpop.f32.mrf.mxu0  ;;  %v2075_v6 = vadd.f32 %v2074_v48, %v3391_v55 }
 0xad0   :  { %v2076_v49 = vpop.f32.mrf.mxu1 }
 0xad1   :  { %v3797_v1 = vpop.f32.mrf.mxu0  ;;  %v2077_v52 = vadd.f32 %v2076_v49, %v3394_v56 }
 0xad2   :  { %v2080_v42 = vpop.f32.mrf.mxu1 }
 0xad3   :  { %v2081_v60 = vadd.f32 %v2080_v42, %v3391_v55 }
 0xad4   :  { %v2082_v50 = vpop.f32.mrf.mxu1 }
 0xad5   :  { %v3037_v25 = vpop.eup %3036  ;;  %v2083_v39 = vadd.f32 %v2082_v50, %v3394_v56 }
 0xad6   :  { %v1909_v36 = vmul.f32 %v3037_v25, %v1907_v41 }
 0xad7   :  { %v3039_v45 = vpop.eup %3038 }
 0xad8   :  { %v1911_v62 = vadd.f32 %v1909_v36, %v1905_v51  ;;  %v1908_v46 = vmul.f32 %v3039_v45, %v1906_v43  ;;  %v2157_v51 = vadd.f32 %v3795_v58, %v3539_v37  ;;  %v2152_v43 = vadd.f32 %v3797_v1, %v3539_v37 }
 0xada   :  { %1914 = vst [vmem:[#allocation8 + $0x28] sm:$0xff] %v1911_v62  ;;  %2923 = vmatprep.subr.mxu0 %v1911_v62  ;;  %v3786_v3 = vadd.f32 %v1908_v46, %v1904_v61 }
 0xadb   :  { %2924 = vmatpush3.msra.mxu0 %v1911_v62 }
 0xadc   :  { %2925 = vmatprep.subr.mxu0 %v3786_v3  ;;  %1913 = vst [vmem:[#allocation8 + $0x20] sm:$0xff] %v3786_v3 }
 0xadd   :  { %2926 = vmatpush3.msra.mxu0 %v3786_v3 }
 0xade   :  { %2928 = vmatmul.mubr.msk.f32.vlgmr.msra.gmra.mxu0 %vm116_vm0, %v3753_v0 }
 0xadf   :  { %2934 = vmatprep.mubr.msk.f32.mxu0 %vm116_vm0, %v3746_v63 }
 0xb9e   :  { %v2929_v2 = vpop.f32.mrf.mxu0 }
 0xba0   :  { %v2226_v26 = vpop.f32.mrf.mxu0 }
 0xba1   :  { %2300 = vmatmul.mubr.f32.vlgmr.msra.gmra.mxu1 %v2226_v26  ;;  %v2499_v26 = vrot.slane %v3786_v3, %v3890_v59 }
 0xba2   :  { %2305 = vmatprep.mubr.f32.mxu1 %v3872_v44 }
 0xba5   :  { %2306 = vmatmul.mubr.f32.gmra.mxu1 %v2929_v2 }
 0xc61   :  { %v2301_v33 = vpop.f32.mrf.mxu1 }
 0xc62   :  { %v3802_v63 = vadd.f32 %v2301_v33, %v2075_v6 }
 0xc63   :  { %v2303_v57 = vpop.f32.mrf.mxu1 }
 0xc64   :  { %v2326_v53 = vadd.f32 %v2303_v57, %v2077_v52  ;;  %v2593_v54 = vmul.f32 -1.442695, %v3802_v63 }
 0xc65   :  { %v2307_v4 = vpop.f32.mrf.mxu1 }
 0xc66   :  { %v2595_v44 = vmul.f32 -1.442695, %v2326_v53  ;;  %v3806_v35 = vadd.f32 %v2307_v4, %v2081_v60 }
 0xc67   :  { %v2309_v38 = vpop.f32.mrf.mxu1 }
 0xc68   :  { %3040 = vpow2.f32 %v2595_v44  ;;  %v2327_v47 = vadd.f32 %v2309_v38, %v2083_v39  ;;  %v2594_v24 = vmul.f32 -1.442695, %v3806_v35 }
 0xc6a   :  { %v2596_v34 = vmul.f32 -1.442695, %v2327_v47 }
 0xc6c   :  { %3042 = vpow2.f32 %v2596_v34 }
 0xc75   :  { %v3041_v5 = vpop.eup %3040 }
 0xc76   :  { %v2334_v7 = vadd.f32 1.0, %v3041_v5 }
 0xc78   :  { %3044 = vrcp.f32 %v2334_v7 }
 0xc79   :  { %v3043_v8 = vpop.eup %3042 }
 0xc7a   :  { %v2335_v15 = vadd.f32 1.0, %v3043_v8 }
 0xc7c   :  { %3046 = vrcp.f32 %v2335_v15 }
 0xc7d   :  { %3048 = vpow2.f32 %v2594_v24 }
 0xc7e   :  { %3050 = vpow2.f32 %v2593_v54 }
 0xc85   :  { %v3045_v16 = vpop.eup %3044 }
 0xc86   :  { %v2340_v56 = vmul.f32 %v3045_v16, %v3786_v3 }
 0xc89   :  { %v3047_v55 = vpop.eup %3046 }
 0xc8a   :  { %v2341_v17 = vmul.f32 %v3047_v55, %v1911_v62  ;;  %v3049_v32 = vpop.eup %3048 }
 0xc8b   :  { %v3051_v40 = vpop.eup %3050  ;;  %v2321_v41 = vadd.f32 1.0, %v3049_v32 }
 0xc8c   :  { %2930 = vmatprep.subr.mxu0 %v2341_v17  ;;  %v2320_v25 = vadd.f32 1.0, %v3051_v40 }
 0xc8d   :  { %2931 = vmatpush3.msra.mxu0 %v2341_v17  ;;  %3052 = vrcp.f32 %v2321_v41 }
 0xc8e   :  { %2932 = vmatprep.subr.mxu0 %v2340_v56  ;;  %3054 = vrcp.f32 %v2320_v25 }
 0xc8f   :  { %2933 = vmatpush3.msra.mxu0 %v2340_v56 }
 0xc90   :  { %2935 = vmatmul.mubr.msk.f32.vlgmr.msra.gmra.mxu0 %vm116_vm0, %v3753_v0  ;;  %2937 = vmatprep.subr.mxu0 %v3089_v18  ;;  %v3096_v0 = vld [vmem:[#allocation6 + $0x40] sm:$0xff] }
 0xc91   :  { %2938 = vmatpush3.msra.mxu0 %v3089_v18 }
 0xc92   :  { %2939 = vmatprep.subr.mxu0 %v3090_v19 }
 0xc93   :  { %2940 = vmatpush3.msra.mxu0 %v3090_v19 }
 0xc94   :  { %2941 = vmatprep.subr.mxu0 %v3091_v20 }
 0xc95   :  { %2942 = vmatpush3.msra.mxu0 %v3091_v20 }
 0xc96   :  { %2943 = vmatprep.subr.mxu0 %v3092_v21 }
 0xc97   :  { %2944 = vmatpush3.msra.mxu0 %v3092_v21 }
 0xc98   :  { %2945 = vmatprep.subr.mxu0 %v3093_v22 }
 0xc99   :  { %2946 = vmatpush3.msra.mxu0 %v3093_v22 }
 0xc9a   :  { %2947 = vmatprep.subr.mxu0 %v3094_v23  ;;  %v3053_v46 = vpop.eup %3052 }
 0xc9b   :  { %2948 = vmatpush3.msra.mxu0 %v3094_v23  ;;  %v3055_v2 = vpop.eup %3054  ;;  %v2503_v48 = vsub.f32 1.0, %v3053_v46  ;;  %v2501_v42 = vmul.f32 %v3053_v46, %v2499_v26 }
 0xc9c   :  { %2949 = vmatprep.subr.mxu0 %v3095_v27  ;;  %v2502_v50 = vsub.f32 1.0, %v3055_v2  ;;  %v2500_v1 = vmul.f32 %v3055_v2, %v2499_v26 }
 0xc9d   :  { %2950 = vmatpush3.msra.mxu0 %v3095_v27 }
 0xc9e   :  { %2951 = vmatprep.subr.mxu0 %v3096_v0 }
 0xc9f   :  { %2952 = vmatpush3.msra.mxu0 %v3096_v0 }
 0xca0   :  { %2953 = vmatprep.subr.mxu0 %v3097_v28 }
 0xca1   :  { %2954 = vmatpush3.msra.mxu0 %v3097_v28 }
 0xca2   :  { %2955 = vmatprep.subr.mxu0 %v3098_v29 }
 0xca3   :  { %2956 = vmatpush3.msra.mxu0 %v3098_v29 }
 0xca4   :  { %2957 = vmatprep.subr.mxu0 %v3099_v30 }
 0xca5   :  { %2958 = vmatpush3.msra.mxu0 %v3099_v30 }
 0xca6   :  { %2959 = vmatprep.subr.mxu0 %v3100_v31 }
 0xca7   :  { %2960 = vmatpush3.msra.mxu0 %v3100_v31 }
 0xca8   :  { %2961 = vmatprep.subr.mxu0 %v3101_v9 }
 0xca9   :  { %2962 = vmatpush3.msra.mxu0 %v3101_v9 }
 0xcaa   :  { %2963 = vmatprep.subr.mxu0 %v3102_v10 }
 0xcab   :  { %2964 = vmatpush3.msra.mxu0 %v3102_v10 }
 0xcac   :  { %2965 = vmatprep.subr.mxu0 %v3103_v11 }
 0xcad   :  { %2966 = vmatpush3.msra.mxu0 %v3103_v11 }
 0xcae   :  { %2967 = vmatprep.subr.mxu0 %v3104_v12 }
 0xcaf   :  { %2968 = vmatpush3.msra.mxu0 %v3104_v12 }
 0xd50   :  { %v2936_v13 = vpop.f32.mrf.mxu0 }
 0xd52   :  { %v2408_v14 = vpop.f32.mrf.mxu0 }
 0xd53   :  { %2969 = vmatprep.mubr.f32.mxu0 %v2408_v14 }
 0xd54   :  { %2970 = vmatmul.mubr.f32.vlgmr.msra.gmra.mxu0 %v2936_v13 }
 0xe14   :  { %v2971_v36 = vpop.f32.mrf.mxu0 }
 0xe15   :  { %v2493_v45 = vadd.f32 %v2971_v36, %v2157_v51 }
 0xe16   :  { %v2483_v61 = vpop.f32.mrf.mxu0 }
 0xe17   :  { %3056 = vtanh.f32 %v2493_v45  ;;  %v2492_v62 = vadd.f32 %v2483_v61, %v2152_v43 }
 0xe19   :  { %3058 = vtanh.f32 %v2492_v62 }
 0xe24   :  { %v3057_v49 = vpop.eup %3056 }
 0xe25   :  { %v2505_v58 = vmul.f32 %v3057_v49, %v2503_v48 }
 0xe26   :  { %v3059_v6 = vpop.eup %3058 }
 0xe27   :  { %v2507_v37 = vadd.f32 %v2505_v58, %v2501_v42  ;;  %v2504_v33 = vmul.f32 %v3059_v6, %v2502_v50 }
 0xe29   :  { %2510 = vst [vmem:[#allocation8 + $0x38] sm:$0xff] %v2507_v37  ;;  %v2506_v52 = vadd.f32 %v2504_v33, %v2500_v1 }
 0xe2b   :  { %2509 = vst [vmem:[#allocation8 + $0x30] sm:$0xff] %v2506_v52 }
 0xe2c   :  { %3156 = shalt.err (!%p3153_p0)
}
 0xe2d   :  { %2524 = dma.vmem_to_hbm [thread:$0]  %s2519_s2, 1024, %s3831_s6, [#allocation5], %s3175_s7, %s3175_s7, %s3176_s8  }
 0xe2e   :  { %3169 = dma.done.wait [#allocation5], 1024  }
 0xe2f   :  { %3170 = vsyncadd [#allocation5], 4294966272 }
 0xe30   :  { %2528 = vsyncpa [#allocation4], 1 }
 0xe31   :  { %2529 = vsyncpa [#allocation7], 1 }
 0xe32   :  { %2530 = vsyncpa [#allocation5], 1 }

</bundles_post_ra>
